<compile_context>
chip_gen: v7x
topology: tpu7x:2x2x1
jax: 0.10.0
libtpu: 0.0.40
codegen_flags: <defaults>
</compile_context>

<pallas_src>
import numpy as np

import jax
import jax.numpy as jnp
from jax.experimental import pallas as pl
from jax.experimental.pallas import tpu as pltpu

VMEM_SPEC = pl.BlockSpec(memory_space=pltpu.MemorySpace.VMEM)


# ---------------------------------------------------------------------------
# In-kernel helpers (static shapes; only iota / compare / select / dot /
# reductions, which all lower robustly in Mosaic).
# ---------------------------------------------------------------------------
def _interleave_rows(a, b):
    """Return rows [a0, b0, a1, b1, ...] via two tiny permutation matmuls."""
    r = a.shape[0]
    o = jax.lax.broadcasted_iota(jnp.int32, (2 * r, r), 0)
    s = jax.lax.broadcasted_iota(jnp.int32, (2 * r, r), 1)
    p_even = jnp.where(o == 2 * s, 1.0, 0.0)
    p_odd = jnp.where(o == 2 * s + 1, 1.0, 0.0)
    return (jnp.dot(p_even, a, preferred_element_type=jnp.float32)
            + jnp.dot(p_odd, b, preferred_element_type=jnp.float32))


def _shift_rows(x, h, direction):
    """Image-row shift inside each image of a [B*h, L] row-major stack.

    direction=+1 returns row i+1 (zero at i == h-1); direction=-1 returns row
    i-1 (zero at i == 0).  `h` must be a power of two (bit-mask boundary
    test); shifts never cross image/batch boundaries.
    """
    r = x.shape[0]
    o = jax.lax.broadcasted_iota(jnp.int32, (r, r), 0)
    s = jax.lax.broadcasted_iota(jnp.int32, (r, r), 1)
    if direction > 0:
        keep = jnp.logical_and(s == o + 1, (s & (h - 1)) != 0)
    else:
        keep = jnp.logical_and(s == o - 1, (o & (h - 1)) != 0)
    perm = jnp.where(keep, 1.0, 0.0)
    return jnp.dot(perm, x, preferred_element_type=jnp.float32)


def _bn_leaky_relu(x, gamma_f, beta_f, c):
    """Training-mode BatchNorm2d over (N, H, W) + LeakyReLU(0.01).

    x: [B*OH, OW*c], lanes are (oj, channel).  Per-channel statistics are
    gathered with a channel-grouping matmul so the lane->channel reduction
    never needs to move lane data into sublanes.  gamma_f / beta_f are
    pre-tiled to [1, OW*c].  `c` must be a power of two.
    """
    rows, l = x.shape
    cnt = float(rows * (l // c))
    a = jax.lax.broadcasted_iota(jnp.int32, (l, l), 0)
    b = jax.lax.broadcasted_iota(jnp.int32, (l, l), 1)
    grp = jnp.where((a & (c - 1)) == (b & (c - 1)), 1.0, 0.0)
    s1 = jnp.sum(x, axis=0, keepdims=True)
    s2 = jnp.sum(x * x, axis=0, keepdims=True)
    mean = jnp.dot(s1, grp, preferred_element_type=jnp.float32) / cnt
    ex2 = jnp.dot(s2, grp, preferred_element_type=jnp.float32) / cnt
    var = ex2 - mean * mean
    y = (x - mean) * (jax.lax.rsqrt(var + 1e-5) * gamma_f) + beta_f
    return jnp.where(y >= 0.0, y, 0.01 * y)


# ---------------------------------------------------------------------------
# The single fused kernel.
# ---------------------------------------------------------------------------
def _make_fused_kernel(meta):
    layers = meta["layers"]  # tuple of (H, W, Cin, Cout) per ConvTranspose block

    def kernel(*refs):
        o_ref = refs[-1]
        mu = refs[0][...]
        logvar = refs[1][...]
        eps = refs[2][...]
        wl0 = refs[3][...]
        wl1 = refs[4][...]
        bl0 = refs[5][...]
        bl1 = refs[6][...]

        # reparameterize + decoder_input Linear, emitted directly in the
        # row-major NHWC layout: rows = (b, image-row i), lanes = (j, c).
        z = eps * jnp.exp(0.5 * logvar) + mu
        r0 = jnp.dot(z, wl0, preferred_element_type=jnp.float32) + bl0
        r1 = jnp.dot(z, wl1, preferred_element_type=jnp.float32) + bl1
        feat = _interleave_rows(r0, r1)                 # [B*2, 2*C0]

        idx = 7
        for (h, _w, _cin, cout) in layers:
            w_even = refs[idx][...]
            w_odd = refs[idx + 1][...]
            gamma_f = refs[idx + 2][...]
            beta_f = refs[idx + 3][...]
            idx += 4
            # ConvTranspose2d(k=3, s=2, p=1, op=1) via even/odd (sub-pixel)
            # output-row decomposition; bias omitted (cancels in BN below).
            f_next = _shift_rows(feat, h, +1)
            y_even = jnp.dot(feat, w_even, preferred_element_type=jnp.float32)
            y_odd = jnp.dot(jnp.concatenate([feat, f_next], axis=1), w_odd,
                            preferred_element_type=jnp.float32)
            y = _interleave_rows(y_even, y_odd)         # [B*2h, 2w*cout]
            feat = _bn_leaky_relu(y, gamma_f, beta_f, cout)

        # final Conv2d(c -> 3, k=3, pad=1) + Tanh, as one matmul over the
        # three vertically shifted copies of the feature rows.
        w_fin = refs[idx][...]
        b_fin = refs[idx + 1][...]
        h_fin = 2 * layers[-1][0]
        f_up = _shift_rows(feat, h_fin, -1)
        f_dn = _shift_rows(feat, h_fin, +1)
        f_cat = jnp.concatenate([f_up, feat, f_dn], axis=1)
        o_ref[...] = jnp.tanh(
            jnp.dot(f_cat, w_fin, preferred_element_type=jnp.float32) + b_fin)

    return kernel


def make_forward(meta):
    kernel = _make_fused_kernel(meta)
    n_plan = 4 + 4 * len(meta["layers"]) + 2
    b, h_out, w_out = meta["B"], meta["Hout"], meta["Wout"]

    @jax.jit
    def forward(plan, x, eps):
        mu = x[:, :, 0]
        logvar = x[:, :, 1]
        out_rows = pl.pallas_call(
            kernel,
            out_shape=jax.ShapeDtypeStruct((b * h_out, w_out * 3), jnp.float32),
            in_specs=[VMEM_SPEC] * (3 + n_plan),
            out_specs=VMEM_SPEC,
        )(mu, logvar, eps, *plan)
        # [B*H, W*3] (rows = (b, i), lanes = (j, rgb)) -> NCHW
        return out_rows.reshape(b, h_out, w_out, 3).transpose(0, 3, 1, 2)

    return forward


# ---------------------------------------------------------------------------
# One-time host-side parameter packing (hoisted out of the per-call path).
# ---------------------------------------------------------------------------
def _is_pow2(n):
    return n >= 1 and (n & (n - 1)) == 0


def _convt_row_mix(wt, kh, w):
    """[W*Cin, 2W*Cout] block-banded matrix: one input image row (lanes (j,c))
    -> one output image row of ConvTranspose2d(k=3,s=2,p=1,op=1) for tap row
    kh, with the even/odd column interleave baked in."""
    cin, cout = wt.shape[0], wt.shape[1]
    m = np.zeros((w, cin, 2 * w, cout), np.float32)
    for j in range(w):
        m[j, :, 2 * j, :] += wt[:, :, kh, 1]
        m[j, :, 2 * j + 1, :] += wt[:, :, kh, 2]
        if j + 1 < w:
            m[j + 1, :, 2 * j + 1, :] += wt[:, :, kh, 0]
    return m.reshape(w * cin, 2 * w * cout)


def _conv_row_mix(wc, kh, w):
    """[W*Cin, W*Cout] block-banded matrix for a stride-1 pad-1 3x3 Conv2d,
    tap row kh (input row i + kh - 1 -> output row i)."""
    cout, cin = wc.shape[0], wc.shape[1]
    m = np.zeros((w, cin, w, cout), np.float32)
    for jout in range(w):
        for kw in range(3):
            jin = jout + kw - 1
            if 0 <= jin < w:
                m[jin, :, jout, :] += wc[:, :, kh, kw].T
    return m.reshape(w * cin, w * cout)


def build_plan(params, batch):
    hd = list(params["hidden_dims"])
    rev = hd[::-1]
    c0 = rev[0]
    w0 = 2

    lin_w = np.asarray(params["lin_w"], np.float32)      # [D, 4*c0]
    lin_b = np.asarray(params["lin_b"], np.float32)      # [4*c0]
    plan = []
    for i in range(2):
        # column permutation so the Linear directly emits image row i with
        # lanes ordered (j, c)  (== view(B, c0, 2, 2) then NCHW->NHWC).
        cols = np.array([c * 4 + i * 2 + j for j in range(w0) for c in range(c0)])
        plan.append(jnp.asarray(lin_w[:, cols]))
    for i in range(2):
        cols = np.array([c * 4 + i * 2 + j for j in range(w0) for c in range(c0)])
        plan.append(jnp.asarray(lin_b[cols][None, :]))

    layers = []
    h = w = 2
    for blk in params["convt"]:
        wt = np.asarray(blk["w"], np.float32)             # [Cin, Cout, 3, 3]
        cin, cout = int(wt.shape[0]), int(wt.shape[1])
        assert _is_pow2(h) and _is_pow2(cout)
        w_even = _convt_row_mix(wt, 1, w)
        w_odd = np.concatenate([_convt_row_mix(wt, 2, w),
                                _convt_row_mix(wt, 0, w)], axis=0)
        gamma_f = np.tile(np.asarray(blk["gamma"], np.float32), 2 * w)[None, :]
        beta_f = np.tile(np.asarray(blk["beta"], np.float32), 2 * w)[None, :]
        # NOTE: blk["b"] (ConvTranspose bias) is intentionally dropped: it is a
        # per-channel constant that cancels exactly in training-mode BatchNorm.
        plan += [jnp.asarray(w_even), jnp.asarray(w_odd),
                 jnp.asarray(gamma_f), jnp.asarray(beta_f)]
        layers.append((int(h), int(w), cin, cout))
        h, w = 2 * h, 2 * w

    wc = np.asarray(params["final_conv"]["w"], np.float32)   # [3, Cin, 3, 3]
    bc = np.asarray(params["final_conv"]["b"], np.float32)   # [3]
    assert _is_pow2(h)
    w_fin = np.concatenate([_conv_row_mix(wc, kh, w) for kh in range(3)], axis=0)
    b_fin = np.tile(bc, w)[None, :]
    plan += [jnp.asarray(w_fin), jnp.asarray(b_fin)]

    meta = dict(B=int(batch), layers=tuple(layers), Hout=int(h), Wout=int(w))
    return plan, meta


# ---------------------------------------------------------------------------
# Synthetic parameters (shapes follow the PyTorch module __init__).
# ---------------------------------------------------------------------------
def init_params(key, latent_dim, hidden_dims):
    hd = list(hidden_dims)
    assert latent_dim == hd[-1] * 4  # required by decode()'s .view(B, D//4, 2, 2)
    rev = hd[::-1]
    keys = iter(jax.random.split(key, 16))

    def nrm(shape, scale):
        return scale * jax.random.normal(next(keys), shape, jnp.float32)

    params = {
        "hidden_dims": hd,
        "lin_w": nrm((latent_dim, hd[-1] * 4), 1.0 / np.sqrt(latent_dim)),
        "lin_b": nrm((hd[-1] * 4,), 0.02),
    }
    convt = []
    chain = rev + [rev[-1]]           # 32->16, 16->8, 8->8 (final_layer ConvT)
    for i in range(len(chain) - 1):
        cin, cout = chain[i], chain[i + 1]
        convt.append({
            "w": nrm((cin, cout, 3, 3), 1.0 / np.sqrt(9.0 * cin)),
            "b": nrm((cout,), 0.02),  # dead under training-mode BN (kept for ref)
            # non-trivial affine params to exercise the BN path
            "gamma": 1.0 + 0.1 * jax.random.normal(next(keys), (cout,), jnp.float32),
            "beta": 0.1 * jax.random.normal(next(keys), (cout,), jnp.float32),
        })
    params["convt"] = convt
    c = rev[-1]
    params["final_conv"] = {"w": nrm((3, c, 3, 3), 1.0 / np.sqrt(9.0 * c)),
                            "b": nrm((3,), 0.02)}
    return params


# ---------------------------------------------------------------------------
# Independent pure-JAX reference (lax convolutions), for validation only.
# ---------------------------------------------------------------------------
def reference_forward(params, x, eps):
    mu, logvar = x[:, :, 0], x[:, :, 1]
    z = eps * jnp.exp(0.5 * logvar) + mu
    h = jnp.dot(z, params["lin_w"],
                precision=jax.lax.Precision.HIGHEST) + params["lin_b"][None, :]
    b = x.shape[0]
    c0 = params["lin_w"].shape[1] // 4
    feat = h.reshape(b, c0, 2, 2).transpose(0, 2, 3, 1)          # NHWC
    for blk in params["convt"]:
        wt = blk["w"]                                            # [Cin,Cout,3,3]
        k_hwio = jnp.flip(wt, (2, 3)).transpose(2, 3, 0, 1)      # [3,3,Cin,Cout]
        y = jax.lax.conv_general_dilated(
            feat, k_hwio, window_strides=(1, 1), padding=((1, 2), (1, 2)),
            lhs_dilation=(2, 2), dimension_numbers=("NHWC", "HWIO", "NHWC"),
            precision=jax.lax.Precision.HIGHEST)
        y = y + blk["b"][None, None, None, :]
        mean = jnp.mean(y, axis=(0, 1, 2), keepdims=True)
        var = jnp.mean((y - mean) ** 2, axis=(0, 1, 2), keepdims=True)
        y = (y - mean) / jnp.sqrt(var + 1e-5) * blk["gamma"] + blk["beta"]
        feat = jnp.where(y >= 0, y, 0.01 * y)
    wc = params["final_conv"]["w"]                               # [3,Cin,3,3]
    k_hwio = wc.transpose(2, 3, 1, 0)
    y = jax.lax.conv_general_dilated(
        feat, k_hwio, window_strides=(1, 1), padding=((1, 1), (1, 1)),
        dimension_numbers=("NHWC", "HWIO", "NHWC"),
        precision=jax.lax.Precision.HIGHEST)
    y = jnp.tanh(y + params["final_conv"]["b"][None, None, None, :])
    return y.transpose(0, 3, 1, 2)                               # NCHW


# ---------------------------------------------------------------------------
if __name__ == "__main__":
    key = jax.random.PRNGKey(0)
    k_param, k_in, k_eps = jax.random.split(key, 3)

    hidden_dims = [8, 16, 32]
    latent_dim = hidden_dims[-1] * 4           # required by decode()'s view()
    B = 2

    params = init_params(k_param, latent_dim, hidden_dims)
    plan, meta = build_plan(params, B)         # one-time packing (outside jit)
    forward = make_forward(meta)               # jitted wrapper around the kernel

    x = jax.random.normal(k_in, (B, latent_dim, 2), jnp.float32)
    eps = jax.random.normal(k_eps, (B, latent_dim), jnp.float32)

    out = forward(plan, x, eps)
    out = jax.block_until_ready(out)

    assert out.shape == (B, 3, 16, 16), out.shape
    assert bool(jnp.all(jnp.isfinite(out)))

    ref = reference_forward(params, x, eps)
    # Slack covers MXU default-precision f32 matmuls in the kernel vs. the
    # HIGHEST-precision XLA reference; structural errors would be O(0.1 - 1).
    err = float(jnp.max(jnp.abs(out - ref)))
    assert err < 2e-2, err

    print("KERNEL_OK")
</pallas_src>

<mosaic_0001>
module attributes {stable_mosaic.version = 11 : i64} {
  func.func @kernel(%arg0: memref<2x128xf32, #tpu.memory_space<vmem>>, %arg1: memref<2x128xf32, #tpu.memory_space<vmem>>, %arg2: memref<2x128xf32, #tpu.memory_space<vmem>>, %arg3: memref<128x64xf32, #tpu.memory_space<vmem>>, %arg4: memref<128x64xf32, #tpu.memory_space<vmem>>, %arg5: memref<1x64xf32, #tpu.memory_space<vmem>>, %arg6: memref<1x64xf32, #tpu.memory_space<vmem>>, %arg7: memref<64x64xf32, #tpu.memory_space<vmem>>, %arg8: memref<128x64xf32, #tpu.memory_space<vmem>>, %arg9: memref<1x64xf32, #tpu.memory_space<vmem>>, %arg10: memref<1x64xf32, #tpu.memory_space<vmem>>, %arg11: memref<64x64xf32, #tpu.memory_space<vmem>>, %arg12: memref<128x64xf32, #tpu.memory_space<vmem>>, %arg13: memref<1x64xf32, #tpu.memory_space<vmem>>, %arg14: memref<1x64xf32, #tpu.memory_space<vmem>>, %arg15: memref<64x128xf32, #tpu.memory_space<vmem>>, %arg16: memref<128x128xf32, #tpu.memory_space<vmem>>, %arg17: memref<1x128xf32, #tpu.memory_space<vmem>>, %arg18: memref<1x128xf32, #tpu.memory_space<vmem>>, %arg19: memref<384x48xf32, #tpu.memory_space<vmem>>, %arg20: memref<1x48xf32, #tpu.memory_space<vmem>>, %arg21: memref<32x48xf32, #tpu.memory_space<vmem>>) attributes {dimension_semantics = [], scalar_prefetch = 0 : i64, scratch_operands = 0 : i64, tpu.core_type = #tpu.core_type<tc>} {
    %c0 = arith.constant 0 : index
    %c0_0 = arith.constant 0 : index
    %0 = vector.load %arg0[%c0, %c0_0] : memref<2x128xf32, #tpu.memory_space<vmem>>, vector<2x128xf32>
    %c0_1 = arith.constant 0 : index
    %c0_2 = arith.constant 0 : index
    %1 = vector.load %arg1[%c0_1, %c0_2] : memref<2x128xf32, #tpu.memory_space<vmem>>, vector<2x128xf32>
    %c0_3 = arith.constant 0 : index
    %c0_4 = arith.constant 0 : index
    %2 = vector.load %arg2[%c0_3, %c0_4] : memref<2x128xf32, #tpu.memory_space<vmem>>, vector<2x128xf32>
    %c0_5 = arith.constant 0 : index
    %c0_6 = arith.constant 0 : index
    %3 = vector.load %arg3[%c0_5, %c0_6] : memref<128x64xf32, #tpu.memory_space<vmem>>, vector<128x64xf32>
    %c0_7 = arith.constant 0 : index
    %c0_8 = arith.constant 0 : index
    %4 = vector.load %arg4[%c0_7, %c0_8] : memref<128x64xf32, #tpu.memory_space<vmem>>, vector<128x64xf32>
    %c0_9 = arith.constant 0 : index
    %c0_10 = arith.constant 0 : index
    %5 = vector.load %arg5[%c0_9, %c0_10] : memref<1x64xf32, #tpu.memory_space<vmem>>, vector<1x64xf32>
    %c0_11 = arith.constant 0 : index
    %c0_12 = arith.constant 0 : index
    %6 = vector.load %arg6[%c0_11, %c0_12] : memref<1x64xf32, #tpu.memory_space<vmem>>, vector<1x64xf32>
    %cst = arith.constant 5.000000e-01 : f32
    %7 = vector.broadcast %cst : f32 to vector<2x128xf32>
    %8 = arith.mulf %7, %1 : vector<2x128xf32>
    %9 = math.exp %8 : vector<2x128xf32>
    %10 = arith.mulf %2, %9 : vector<2x128xf32>
    %11 = arith.addf %10, %0 : vector<2x128xf32>
    %cst_13 = arith.constant dense<0.000000e+00> : vector<2x64xf32>
    %12 = tpu.matmul %11, %3, %cst_13 {dimension_numbers = #tpu.dot_dimension_numbers<[1], [0], [0], [1], [0, 0, 1, 1], [], []>} : vector<2x128xf32>, vector<128x64xf32>, vector<2x64xf32> -> vector<2x64xf32>
    %13 = vector.broadcast %5 : vector<1x64xf32> to vector<2x64xf32>
    %14 = arith.addf %12, %13 : vector<2x64xf32>
    %cst_14 = arith.constant dense<0.000000e+00> : vector<2x64xf32>
    %15 = tpu.matmul %11, %4, %cst_14 {dimension_numbers = #tpu.dot_dimension_numbers<[1], [0], [0], [1], [0, 0, 1, 1], [], []>} : vector<2x128xf32>, vector<128x64xf32>, vector<2x64xf32> -> vector<2x64xf32>
    %16 = vector.broadcast %6 : vector<1x64xf32> to vector<2x64xf32>
    %17 = arith.addf %15, %16 : vector<2x64xf32>
    %18 = tpu.iota {dimensions = array<i32: 0>} : vector<4x2xi32>
    %19 = tpu.iota {dimensions = array<i32: 1>} : vector<4x2xi32>
    %c2_i32 = arith.constant 2 : i32
    %20 = vector.broadcast %c2_i32 : i32 to vector<4x2xi32>
    %21 = arith.muli %20, %19 : vector<4x2xi32>
    %22 = arith.cmpi eq, %18, %21 : vector<4x2xi32>
    %cst_15 = arith.constant 1.000000e+00 : f32
    %cst_16 = arith.constant 0.000000e+00 : f32
    %23 = vector.broadcast %cst_15 : f32 to vector<4x2xf32>
    %24 = vector.broadcast %cst_16 : f32 to vector<4x2xf32>
    %25 = arith.select %22, %23, %24 : vector<4x2xi1>, vector<4x2xf32>
    %c2_i32_17 = arith.constant 2 : i32
    %26 = vector.broadcast %c2_i32_17 : i32 to vector<4x2xi32>
    %27 = arith.muli %26, %19 : vector<4x2xi32>
    %c1_i32 = arith.constant 1 : i32
    %28 = vector.broadcast %c1_i32 : i32 to vector<4x2xi32>
    %29 = arith.addi %27, %28 : vector<4x2xi32>
    %30 = arith.cmpi eq, %18, %29 : vector<4x2xi32>
    %cst_18 = arith.constant 1.000000e+00 : f32
    %cst_19 = arith.constant 0.000000e+00 : f32
    %31 = vector.broadcast %cst_18 : f32 to vector<4x2xf32>
    %32 = vector.broadcast %cst_19 : f32 to vector<4x2xf32>
    %33 = arith.select %30, %31, %32 : vector<4x2xi1>, vector<4x2xf32>
    %cst_20 = arith.constant dense<0.000000e+00> : vector<4x64xf32>
    %34 = tpu.matmul %25, %14, %cst_20 {dimension_numbers = #tpu.dot_dimension_numbers<[1], [0], [0], [1], [0, 0, 1, 1], [], []>} : vector<4x2xf32>, vector<2x64xf32>, vector<4x64xf32> -> vector<4x64xf32>
    %cst_21 = arith.constant dense<0.000000e+00> : vector<4x64xf32>
    %35 = tpu.matmul %33, %17, %cst_21 {dimension_numbers = #tpu.dot_dimension_numbers<[1], [0], [0], [1], [0, 0, 1, 1], [], []>} : vector<4x2xf32>, vector<2x64xf32>, vector<4x64xf32> -> vector<4x64xf32>
    %36 = arith.addf %34, %35 : vector<4x64xf32>
    %c0_22 = arith.constant 0 : index
    %c0_23 = arith.constant 0 : index
    %37 = vector.load %arg7[%c0_22, %c0_23] : memref<64x64xf32, #tpu.memory_space<vmem>>, vector<64x64xf32>
    %c0_24 = arith.constant 0 : index
    %c0_25 = arith.constant 0 : index
    %38 = vector.load %arg8[%c0_24, %c0_25] : memref<128x64xf32, #tpu.memory_space<vmem>>, vector<128x64xf32>
    %c0_26 = arith.constant 0 : index
    %c0_27 = arith.constant 0 : index
    %39 = vector.load %arg9[%c0_26, %c0_27] : memref<1x64xf32, #tpu.memory_space<vmem>>, vector<1x64xf32>
    %c0_28 = arith.constant 0 : index
    %c0_29 = arith.constant 0 : index
    %40 = vector.load %arg10[%c0_28, %c0_29] : memref<1x64xf32, #tpu.memory_space<vmem>>, vector<1x64xf32>
    %41 = tpu.iota {dimensions = array<i32: 0>} : vector<4x4xi32>
    %42 = tpu.iota {dimensions = array<i32: 1>} : vector<4x4xi32>
    %c1_i32_30 = arith.constant 1 : i32
    %43 = vector.broadcast %c1_i32_30 : i32 to vector<4x4xi32>
    %44 = arith.addi %41, %43 : vector<4x4xi32>
    %45 = arith.cmpi eq, %42, %44 : vector<4x4xi32>
    %c1_i32_31 = arith.constant 1 : i32
    %46 = vector.broadcast %c1_i32_31 : i32 to vector<4x4xi32>
    %47 = arith.andi %42, %46 : vector<4x4xi32>
    %c0_i32 = arith.constant 0 : i32
    %48 = vector.broadcast %c0_i32 : i32 to vector<4x4xi32>
    %49 = arith.cmpi ne, %47, %48 : vector<4x4xi32>
    %50 = arith.andi %45, %49 : vector<4x4xi1>
    %cst_32 = arith.constant 1.000000e+00 : f32
    %cst_33 = arith.constant 0.000000e+00 : f32
    %51 = vector.broadcast %cst_32 : f32 to vector<4x4xf32>
    %52 = vector.broadcast %cst_33 : f32 to vector<4x4xf32>
    %53 = arith.select %50, %51, %52 : vector<4x4xi1>, vector<4x4xf32>
    %cst_34 = arith.constant dense<0.000000e+00> : vector<4x64xf32>
    %54 = tpu.matmul %53, %36, %cst_34 {dimension_numbers = #tpu.dot_dimension_numbers<[1], [0], [0], [1], [0, 0, 1, 1], [], []>} : vector<4x4xf32>, vector<4x64xf32>, vector<4x64xf32> -> vector<4x64xf32>
    %cst_35 = arith.constant dense<0.000000e+00> : vector<4x64xf32>
    %55 = tpu.matmul %36, %37, %cst_35 {dimension_numbers = #tpu.dot_dimension_numbers<[1], [0], [0], [1], [0, 0, 1, 1], [], []>} : vector<4x64xf32>, vector<64x64xf32>, vector<4x64xf32> -> vector<4x64xf32>
    %56 = tpu.concatenate %36, %54 in 1 : vector<4x64xf32>, vector<4x64xf32> -> vector<4x128xf32>
    %cst_36 = arith.constant dense<0.000000e+00> : vector<4x64xf32>
    %57 = tpu.matmul %56, %38, %cst_36 {dimension_numbers = #tpu.dot_dimension_numbers<[1], [0], [0], [1], [0, 0, 1, 1], [], []>} : vector<4x128xf32>, vector<128x64xf32>, vector<4x64xf32> -> vector<4x64xf32>
    %58 = tpu.iota {dimensions = array<i32: 0>} : vector<8x4xi32>
    %59 = tpu.iota {dimensions = array<i32: 1>} : vector<8x4xi32>
    %c2_i32_37 = arith.constant 2 : i32
    %60 = vector.broadcast %c2_i32_37 : i32 to vector<8x4xi32>
    %61 = arith.muli %60, %59 : vector<8x4xi32>
    %62 = arith.cmpi eq, %58, %61 : vector<8x4xi32>
    %cst_38 = arith.constant 1.000000e+00 : f32
    %cst_39 = arith.constant 0.000000e+00 : f32
    %63 = vector.broadcast %cst_38 : f32 to vector<8x4xf32>
    %64 = vector.broadcast %cst_39 : f32 to vector<8x4xf32>
    %65 = arith.select %62, %63, %64 : vector<8x4xi1>, vector<8x4xf32>
    %c2_i32_40 = arith.constant 2 : i32
    %66 = vector.broadcast %c2_i32_40 : i32 to vector<8x4xi32>
    %67 = arith.muli %66, %59 : vector<8x4xi32>
    %c1_i32_41 = arith.constant 1 : i32
    %68 = vector.broadcast %c1_i32_41 : i32 to vector<8x4xi32>
    %69 = arith.addi %67, %68 : vector<8x4xi32>
    %70 = arith.cmpi eq, %58, %69 : vector<8x4xi32>
    %cst_42 = arith.constant 1.000000e+00 : f32
    %cst_43 = arith.constant 0.000000e+00 : f32
    %71 = vector.broadcast %cst_42 : f32 to vector<8x4xf32>
    %72 = vector.broadcast %cst_43 : f32 to vector<8x4xf32>
    %73 = arith.select %70, %71, %72 : vector<8x4xi1>, vector<8x4xf32>
    %cst_44 = arith.constant dense<0.000000e+00> : vector<8x64xf32>
    %74 = tpu.matmul %65, %55, %cst_44 {dimension_numbers = #tpu.dot_dimension_numbers<[1], [0], [0], [1], [0, 0, 1, 1], [], []>} : vector<8x4xf32>, vector<4x64xf32>, vector<8x64xf32> -> vector<8x64xf32>
    %cst_45 = arith.constant dense<0.000000e+00> : vector<8x64xf32>
    %75 = tpu.matmul %73, %57, %cst_45 {dimension_numbers = #tpu.dot_dimension_numbers<[1], [0], [0], [1], [0, 0, 1, 1], [], []>} : vector<8x4xf32>, vector<4x64xf32>, vector<8x64xf32> -> vector<8x64xf32>
    %76 = arith.addf %74, %75 : vector<8x64xf32>
    %77 = tpu.iota {dimensions = array<i32: 0>} : vector<64x64xi32>
    %78 = tpu.iota {dimensions = array<i32: 1>} : vector<64x64xi32>
    %c15_i32 = arith.constant 15 : i32
    %79 = vector.broadcast %c15_i32 : i32 to vector<64x64xi32>
    %80 = arith.andi %77, %79 : vector<64x64xi32>
    %c15_i32_46 = arith.constant 15 : i32
    %81 = vector.broadcast %c15_i32_46 : i32 to vector<64x64xi32>
    %82 = arith.andi %78, %81 : vector<64x64xi32>
    %83 = arith.cmpi eq, %80, %82 : vector<64x64xi32>
    %cst_47 = arith.constant 1.000000e+00 : f32
    %cst_48 = arith.constant 0.000000e+00 : f32
    %84 = vector.broadcast %cst_47 : f32 to vector<64x64xf32>
    %85 = vector.broadcast %cst_48 : f32 to vector<64x64xf32>
    %86 = arith.select %83, %84, %85 : vector<64x64xi1>, vector<64x64xf32>
    %cst_49 = arith.constant dense<0.000000e+00> : vector<64xf32>
    %87 = vector.multi_reduction <add>, %76, %cst_49 [0] : vector<8x64xf32> to vector<64xf32>
    %88 = vector.shape_cast %87 : vector<64xf32> to vector<1x64xf32>
    %89 = arith.mulf %76, %76 : vector<8x64xf32>
    %cst_50 = arith.constant dense<0.000000e+00> : vector<64xf32>
    %90 = vector.multi_reduction <add>, %89, %cst_50 [0] : vector<8x64xf32> to vector<64xf32>
    %91 = vector.shape_cast %90 : vector<64xf32> to vector<1x64xf32>
    %cst_51 = arith.constant dense<0.000000e+00> : vector<1x64xf32>
    %92 = tpu.matmul %88, %86, %cst_51 {dimension_numbers = #tpu.dot_dimension_numbers<[1], [0], [0], [1], [0, 0, 1, 1], [], []>} : vector<1x64xf32>, vector<64x64xf32>, vector<1x64xf32> -> vector<1x64xf32>
    %cst_52 = arith.constant 3.200000e+01 : f32
    %93 = vector.broadcast %cst_52 : f32 to vector<1x64xf32>
    %94 = arith.divf %92, %93 : vector<1x64xf32>
    %cst_53 = arith.constant dense<0.000000e+00> : vector<1x64xf32>
    %95 = tpu.matmul %91, %86, %cst_53 {dimension_numbers = #tpu.dot_dimension_numbers<[1], [0], [0], [1], [0, 0, 1, 1], [], []>} : vector<1x64xf32>, vector<64x64xf32>, vector<1x64xf32> -> vector<1x64xf32>
    %cst_54 = arith.constant 3.200000e+01 : f32
    %96 = vector.broadcast %cst_54 : f32 to vector<1x64xf32>
    %97 = arith.divf %95, %96 : vector<1x64xf32>
    %98 = arith.mulf %94, %94 : vector<1x64xf32>
    %99 = arith.subf %97, %98 : vector<1x64xf32>
    %100 = vector.broadcast %94 : vector<1x64xf32> to vector<8x64xf32>
    %101 = arith.subf %76, %100 : vector<8x64xf32>
    %cst_55 = arith.constant 9.99999974E-6 : f32
    %102 = vector.broadcast %cst_55 : f32 to vector<1x64xf32>
    %103 = arith.addf %99, %102 : vector<1x64xf32>
    %104 = math.rsqrt %103 : vector<1x64xf32>
    %105 = arith.mulf %104, %39 : vector<1x64xf32>
    %106 = vector.broadcast %105 : vector<1x64xf32> to vector<8x64xf32>
    %107 = arith.mulf %101, %106 : vector<8x64xf32>
    %108 = vector.broadcast %40 : vector<1x64xf32> to vector<8x64xf32>
    %109 = arith.addf %107, %108 : vector<8x64xf32>
    %cst_56 = arith.constant 0.000000e+00 : f32
    %110 = vector.broadcast %cst_56 : f32 to vector<8x64xf32>
    %111 = arith.cmpf oge, %109, %110 : vector<8x64xf32>
    %cst_57 = arith.constant 0.00999999977 : f32
    %112 = vector.broadcast %cst_57 : f32 to vector<8x64xf32>
    %113 = arith.mulf %112, %109 : vector<8x64xf32>
    %114 = arith.select %111, %109, %113 : vector<8x64xi1>, vector<8x64xf32>
    %c0_58 = arith.constant 0 : index
    %c0_59 = arith.constant 0 : index
    %115 = vector.load %arg11[%c0_58, %c0_59] : memref<64x64xf32, #tpu.memory_space<vmem>>, vector<64x64xf32>
    %c0_60 = arith.constant 0 : index
    %c0_61 = arith.constant 0 : index
    %116 = vector.load %arg12[%c0_60, %c0_61] : memref<128x64xf32, #tpu.memory_space<vmem>>, vector<128x64xf32>
    %c0_62 = arith.constant 0 : index
    %c0_63 = arith.constant 0 : index
    %117 = vector.load %arg13[%c0_62, %c0_63] : memref<1x64xf32, #tpu.memory_space<vmem>>, vector<1x64xf32>
    %c0_64 = arith.constant 0 : index
    %c0_65 = arith.constant 0 : index
    %118 = vector.load %arg14[%c0_64, %c0_65] : memref<1x64xf32, #tpu.memory_space<vmem>>, vector<1x64xf32>
    %119 = tpu.iota {dimensions = array<i32: 0>} : vector<8x8xi32>
    %120 = tpu.iota {dimensions = array<i32: 1>} : vector<8x8xi32>
    %c1_i32_66 = arith.constant 1 : i32
    %121 = vector.broadcast %c1_i32_66 : i32 to vector<8x8xi32>
    %122 = arith.addi %119, %121 : vector<8x8xi32>
    %123 = arith.cmpi eq, %120, %122 : vector<8x8xi32>
    %c3_i32 = arith.constant 3 : i32
    %124 = vector.broadcast %c3_i32 : i32 to vector<8x8xi32>
    %125 = arith.andi %120, %124 : vector<8x8xi32>
    %c0_i32_67 = arith.constant 0 : i32
    %126 = vector.broadcast %c0_i32_67 : i32 to vector<8x8xi32>
    %127 = arith.cmpi ne, %125, %126 : vector<8x8xi32>
    %128 = arith.andi %123, %127 : vector<8x8xi1>
    %cst_68 = arith.constant 1.000000e+00 : f32
    %cst_69 = arith.constant 0.000000e+00 : f32
    %129 = vector.broadcast %cst_68 : f32 to vector<8x8xf32>
    %130 = vector.broadcast %cst_69 : f32 to vector<8x8xf32>
    %131 = arith.select %128, %129, %130 : vector<8x8xi1>, vector<8x8xf32>
    %cst_70 = arith.constant dense<0.000000e+00> : vector<8x64xf32>
    %132 = tpu.matmul %131, %114, %cst_70 {dimension_numbers = #tpu.dot_dimension_numbers<[1], [0], [0], [1], [0, 0, 1, 1], [], []>} : vector<8x8xf32>, vector<8x64xf32>, vector<8x64xf32> -> vector<8x64xf32>
    %cst_71 = arith.constant dense<0.000000e+00> : vector<8x64xf32>
    %133 = tpu.matmul %114, %115, %cst_71 {dimension_numbers = #tpu.dot_dimension_numbers<[1], [0], [0], [1], [0, 0, 1, 1], [], []>} : vector<8x64xf32>, vector<64x64xf32>, vector<8x64xf32> -> vector<8x64xf32>
    %134 = tpu.concatenate %114, %132 in 1 : vector<8x64xf32>, vector<8x64xf32> -> vector<8x128xf32>
    %cst_72 = arith.constant dense<0.000000e+00> : vector<8x64xf32>
    %135 = tpu.matmul %134, %116, %cst_72 {dimension_numbers = #tpu.dot_dimension_numbers<[1], [0], [0], [1], [0, 0, 1, 1], [], []>} : vector<8x128xf32>, vector<128x64xf32>, vector<8x64xf32> -> vector<8x64xf32>
    %136 = tpu.iota {dimensions = array<i32: 0>} : vector<16x8xi32>
    %137 = tpu.iota {dimensions = array<i32: 1>} : vector<16x8xi32>
    %c2_i32_73 = arith.constant 2 : i32
    %138 = vector.broadcast %c2_i32_73 : i32 to vector<16x8xi32>
    %139 = arith.muli %138, %137 : vector<16x8xi32>
    %140 = arith.cmpi eq, %136, %139 : vector<16x8xi32>
    %cst_74 = arith.constant 1.000000e+00 : f32
    %cst_75 = arith.constant 0.000000e+00 : f32
    %141 = vector.broadcast %cst_74 : f32 to vector<16x8xf32>
    %142 = vector.broadcast %cst_75 : f32 to vector<16x8xf32>
    %143 = arith.select %140, %141, %142 : vector<16x8xi1>, vector<16x8xf32>
    %c2_i32_76 = arith.constant 2 : i32
    %144 = vector.broadcast %c2_i32_76 : i32 to vector<16x8xi32>
    %145 = arith.muli %144, %137 : vector<16x8xi32>
    %c1_i32_77 = arith.constant 1 : i32
    %146 = vector.broadcast %c1_i32_77 : i32 to vector<16x8xi32>
    %147 = arith.addi %145, %146 : vector<16x8xi32>
    %148 = arith.cmpi eq, %136, %147 : vector<16x8xi32>
    %cst_78 = arith.constant 1.000000e+00 : f32
    %cst_79 = arith.constant 0.000000e+00 : f32
    %149 = vector.broadcast %cst_78 : f32 to vector<16x8xf32>
    %150 = vector.broadcast %cst_79 : f32 to vector<16x8xf32>
    %151 = arith.select %148, %149, %150 : vector<16x8xi1>, vector<16x8xf32>
    %cst_80 = arith.constant dense<0.000000e+00> : vector<16x64xf32>
    %152 = tpu.matmul %143, %133, %cst_80 {dimension_numbers = #tpu.dot_dimension_numbers<[1], [0], [0], [1], [0, 0, 1, 1], [], []>} : vector<16x8xf32>, vector<8x64xf32>, vector<16x64xf32> -> vector<16x64xf32>
    %cst_81 = arith.constant dense<0.000000e+00> : vector<16x64xf32>
    %153 = tpu.matmul %151, %135, %cst_81 {dimension_numbers = #tpu.dot_dimension_numbers<[1], [0], [0], [1], [0, 0, 1, 1], [], []>} : vector<16x8xf32>, vector<8x64xf32>, vector<16x64xf32> -> vector<16x64xf32>
    %154 = arith.addf %152, %153 : vector<16x64xf32>
    %155 = tpu.iota {dimensions = array<i32: 0>} : vector<64x64xi32>
    %156 = tpu.iota {dimensions = array<i32: 1>} : vector<64x64xi32>
    %c7_i32 = arith.constant 7 : i32
    %157 = vector.broadcast %c7_i32 : i32 to vector<64x64xi32>
    %158 = arith.andi %155, %157 : vector<64x64xi32>
    %c7_i32_82 = arith.constant 7 : i32
    %159 = vector.broadcast %c7_i32_82 : i32 to vector<64x64xi32>
    %160 = arith.andi %156, %159 : vector<64x64xi32>
    %161 = arith.cmpi eq, %158, %160 : vector<64x64xi32>
    %cst_83 = arith.constant 1.000000e+00 : f32
    %cst_84 = arith.constant 0.000000e+00 : f32
    %162 = vector.broadcast %cst_83 : f32 to vector<64x64xf32>
    %163 = vector.broadcast %cst_84 : f32 to vector<64x64xf32>
    %164 = arith.select %161, %162, %163 : vector<64x64xi1>, vector<64x64xf32>
    %cst_85 = arith.constant dense<0.000000e+00> : vector<64xf32>
    %165 = vector.multi_reduction <add>, %154, %cst_85 [0] : vector<16x64xf32> to vector<64xf32>
    %166 = vector.shape_cast %165 : vector<64xf32> to vector<1x64xf32>
    %167 = arith.mulf %154, %154 : vector<16x64xf32>
    %cst_86 = arith.constant dense<0.000000e+00> : vector<64xf32>
    %168 = vector.multi_reduction <add>, %167, %cst_86 [0] : vector<16x64xf32> to vector<64xf32>
    %169 = vector.shape_cast %168 : vector<64xf32> to vector<1x64xf32>
    %cst_87 = arith.constant dense<0.000000e+00> : vector<1x64xf32>
    %170 = tpu.matmul %166, %164, %cst_87 {dimension_numbers = #tpu.dot_dimension_numbers<[1], [0], [0], [1], [0, 0, 1, 1], [], []>} : vector<1x64xf32>, vector<64x64xf32>, vector<1x64xf32> -> vector<1x64xf32>
    %cst_88 = arith.constant 1.280000e+02 : f32
    %171 = vector.broadcast %cst_88 : f32 to vector<1x64xf32>
    %172 = arith.divf %170, %171 : vector<1x64xf32>
    %cst_89 = arith.constant dense<0.000000e+00> : vector<1x64xf32>
    %173 = tpu.matmul %169, %164, %cst_89 {dimension_numbers = #tpu.dot_dimension_numbers<[1], [0], [0], [1], [0, 0, 1, 1], [], []>} : vector<1x64xf32>, vector<64x64xf32>, vector<1x64xf32> -> vector<1x64xf32>
    %cst_90 = arith.constant 1.280000e+02 : f32
    %174 = vector.broadcast %cst_90 : f32 to vector<1x64xf32>
    %175 = arith.divf %173, %174 : vector<1x64xf32>
    %176 = arith.mulf %172, %172 : vector<1x64xf32>
    %177 = arith.subf %175, %176 : vector<1x64xf32>
    %178 = vector.broadcast %172 : vector<1x64xf32> to vector<16x64xf32>
    %179 = arith.subf %154, %178 : vector<16x64xf32>
    %cst_91 = arith.constant 9.99999974E-6 : f32
    %180 = vector.broadcast %cst_91 : f32 to vector<1x64xf32>
    %181 = arith.addf %177, %180 : vector<1x64xf32>
    %182 = math.rsqrt %181 : vector<1x64xf32>
    %183 = arith.mulf %182, %117 : vector<1x64xf32>
    %184 = vector.broadcast %183 : vector<1x64xf32> to vector<16x64xf32>
    %185 = arith.mulf %179, %184 : vector<16x64xf32>
    %186 = vector.broadcast %118 : vector<1x64xf32> to vector<16x64xf32>
    %187 = arith.addf %185, %186 : vector<16x64xf32>
    %cst_92 = arith.constant 0.000000e+00 : f32
    %188 = vector.broadcast %cst_92 : f32 to vector<16x64xf32>
    %189 = arith.cmpf oge, %187, %188 : vector<16x64xf32>
    %cst_93 = arith.constant 0.00999999977 : f32
    %190 = vector.broadcast %cst_93 : f32 to vector<16x64xf32>
    %191 = arith.mulf %190, %187 : vector<16x64xf32>
    %192 = arith.select %189, %187, %191 : vector<16x64xi1>, vector<16x64xf32>
    %c0_94 = arith.constant 0 : index
    %c0_95 = arith.constant 0 : index
    %193 = vector.load %arg15[%c0_94, %c0_95] : memref<64x128xf32, #tpu.memory_space<vmem>>, vector<64x128xf32>
    %c0_96 = arith.constant 0 : index
    %c0_97 = arith.constant 0 : index
    %194 = vector.load %arg16[%c0_96, %c0_97] : memref<128x128xf32, #tpu.memory_space<vmem>>, vector<128x128xf32>
    %c0_98 = arith.constant 0 : index
    %c0_99 = arith.constant 0 : index
    %195 = vector.load %arg17[%c0_98, %c0_99] : memref<1x128xf32, #tpu.memory_space<vmem>>, vector<1x128xf32>
    %c0_100 = arith.constant 0 : index
    %c0_101 = arith.constant 0 : index
    %196 = vector.load %arg18[%c0_100, %c0_101] : memref<1x128xf32, #tpu.memory_space<vmem>>, vector<1x128xf32>
    %197 = tpu.iota {dimensions = array<i32: 0>} : vector<16x16xi32>
    %198 = tpu.iota {dimensions = array<i32: 1>} : vector<16x16xi32>
    %c1_i32_102 = arith.constant 1 : i32
    %199 = vector.broadcast %c1_i32_102 : i32 to vector<16x16xi32>
    %200 = arith.addi %197, %199 : vector<16x16xi32>
    %201 = arith.cmpi eq, %198, %200 : vector<16x16xi32>
    %c7_i32_103 = arith.constant 7 : i32
    %202 = vector.broadcast %c7_i32_103 : i32 to vector<16x16xi32>
    %203 = arith.andi %198, %202 : vector<16x16xi32>
    %c0_i32_104 = arith.constant 0 : i32
    %204 = vector.broadcast %c0_i32_104 : i32 to vector<16x16xi32>
    %205 = arith.cmpi ne, %203, %204 : vector<16x16xi32>
    %206 = arith.andi %201, %205 : vector<16x16xi1>
    %cst_105 = arith.constant 1.000000e+00 : f32
    %cst_106 = arith.constant 0.000000e+00 : f32
    %207 = vector.broadcast %cst_105 : f32 to vector<16x16xf32>
    %208 = vector.broadcast %cst_106 : f32 to vector<16x16xf32>
    %209 = arith.select %206, %207, %208 : vector<16x16xi1>, vector<16x16xf32>
    %cst_107 = arith.constant dense<0.000000e+00> : vector<16x64xf32>
    %210 = tpu.matmul %209, %192, %cst_107 {dimension_numbers = #tpu.dot_dimension_numbers<[1], [0], [0], [1], [0, 0, 1, 1], [], []>} : vector<16x16xf32>, vector<16x64xf32>, vector<16x64xf32> -> vector<16x64xf32>
    %cst_108 = arith.constant dense<0.000000e+00> : vector<16x128xf32>
    %211 = tpu.matmul %192, %193, %cst_108 {dimension_numbers = #tpu.dot_dimension_numbers<[1], [0], [0], [1], [0, 0, 1, 1], [], []>} : vector<16x64xf32>, vector<64x128xf32>, vector<16x128xf32> -> vector<16x128xf32>
    %212 = tpu.concatenate %192, %210 in 1 : vector<16x64xf32>, vector<16x64xf32> -> vector<16x128xf32>
    %cst_109 = arith.constant dense<0.000000e+00> : vector<16x128xf32>
    %213 = tpu.matmul %212, %194, %cst_109 {dimension_numbers = #tpu.dot_dimension_numbers<[1], [0], [0], [1], [0, 0, 1, 1], [], []>} : vector<16x128xf32>, vector<128x128xf32>, vector<16x128xf32> -> vector<16x128xf32>
    %214 = tpu.iota {dimensions = array<i32: 0>} : vector<32x16xi32>
    %215 = tpu.iota {dimensions = array<i32: 1>} : vector<32x16xi32>
    %c2_i32_110 = arith.constant 2 : i32
    %216 = vector.broadcast %c2_i32_110 : i32 to vector<32x16xi32>
    %217 = arith.muli %216, %215 : vector<32x16xi32>
    %218 = arith.cmpi eq, %214, %217 : vector<32x16xi32>
    %cst_111 = arith.constant 1.000000e+00 : f32
    %cst_112 = arith.constant 0.000000e+00 : f32
    %219 = vector.broadcast %cst_111 : f32 to vector<32x16xf32>
    %220 = vector.broadcast %cst_112 : f32 to vector<32x16xf32>
    %221 = arith.select %218, %219, %220 : vector<32x16xi1>, vector<32x16xf32>
    %c2_i32_113 = arith.constant 2 : i32
    %222 = vector.broadcast %c2_i32_113 : i32 to vector<32x16xi32>
    %223 = arith.muli %222, %215 : vector<32x16xi32>
    %c1_i32_114 = arith.constant 1 : i32
    %224 = vector.broadcast %c1_i32_114 : i32 to vector<32x16xi32>
    %225 = arith.addi %223, %224 : vector<32x16xi32>
    %226 = arith.cmpi eq, %214, %225 : vector<32x16xi32>
    %cst_115 = arith.constant 1.000000e+00 : f32
    %cst_116 = arith.constant 0.000000e+00 : f32
    %227 = vector.broadcast %cst_115 : f32 to vector<32x16xf32>
    %228 = vector.broadcast %cst_116 : f32 to vector<32x16xf32>
    %229 = arith.select %226, %227, %228 : vector<32x16xi1>, vector<32x16xf32>
    %cst_117 = arith.constant dense<0.000000e+00> : vector<32x128xf32>
    %230 = tpu.matmul %221, %211, %cst_117 {dimension_numbers = #tpu.dot_dimension_numbers<[1], [0], [0], [1], [0, 0, 1, 1], [], []>} : vector<32x16xf32>, vector<16x128xf32>, vector<32x128xf32> -> vector<32x128xf32>
    %cst_118 = arith.constant dense<0.000000e+00> : vector<32x128xf32>
    %231 = tpu.matmul %229, %213, %cst_118 {dimension_numbers = #tpu.dot_dimension_numbers<[1], [0], [0], [1], [0, 0, 1, 1], [], []>} : vector<32x16xf32>, vector<16x128xf32>, vector<32x128xf32> -> vector<32x128xf32>
    %232 = arith.addf %230, %231 : vector<32x128xf32>
    %233 = tpu.iota {dimensions = array<i32: 0>} : vector<128x128xi32>
    %234 = tpu.iota {dimensions = array<i32: 1>} : vector<128x128xi32>
    %c7_i32_119 = arith.constant 7 : i32
    %235 = vector.broadcast %c7_i32_119 : i32 to vector<128x128xi32>
    %236 = arith.andi %233, %235 : vector<128x128xi32>
    %c7_i32_120 = arith.constant 7 : i32
    %237 = vector.broadcast %c7_i32_120 : i32 to vector<128x128xi32>
    %238 = arith.andi %234, %237 : vector<128x128xi32>
    %239 = arith.cmpi eq, %236, %238 : vector<128x128xi32>
    %cst_121 = arith.constant 1.000000e+00 : f32
    %cst_122 = arith.constant 0.000000e+00 : f32
    %240 = vector.broadcast %cst_121 : f32 to vector<128x128xf32>
    %241 = vector.broadcast %cst_122 : f32 to vector<128x128xf32>
    %242 = arith.select %239, %240, %241 : vector<128x128xi1>, vector<128x128xf32>
    %cst_123 = arith.constant dense<0.000000e+00> : vector<128xf32>
    %243 = vector.multi_reduction <add>, %232, %cst_123 [0] : vector<32x128xf32> to vector<128xf32>
    %244 = vector.shape_cast %243 : vector<128xf32> to vector<1x128xf32>
    %245 = arith.mulf %232, %232 : vector<32x128xf32>
    %cst_124 = arith.constant dense<0.000000e+00> : vector<128xf32>
    %246 = vector.multi_reduction <add>, %245, %cst_124 [0] : vector<32x128xf32> to vector<128xf32>
    %247 = vector.shape_cast %246 : vector<128xf32> to vector<1x128xf32>
    %cst_125 = arith.constant dense<0.000000e+00> : vector<1x128xf32>
    %248 = tpu.matmul %244, %242, %cst_125 {dimension_numbers = #tpu.dot_dimension_numbers<[1], [0], [0], [1], [0, 0, 1, 1], [], []>} : vector<1x128xf32>, vector<128x128xf32>, vector<1x128xf32> -> vector<1x128xf32>
    %cst_126 = arith.constant 5.120000e+02 : f32
    %249 = vector.broadcast %cst_126 : f32 to vector<1x128xf32>
    %250 = arith.divf %248, %249 : vector<1x128xf32>
    %cst_127 = arith.constant dense<0.000000e+00> : vector<1x128xf32>
    %251 = tpu.matmul %247, %242, %cst_127 {dimension_numbers = #tpu.dot_dimension_numbers<[1], [0], [0], [1], [0, 0, 1, 1], [], []>} : vector<1x128xf32>, vector<128x128xf32>, vector<1x128xf32> -> vector<1x128xf32>
    %cst_128 = arith.constant 5.120000e+02 : f32
    %252 = vector.broadcast %cst_128 : f32 to vector<1x128xf32>
    %253 = arith.divf %251, %252 : vector<1x128xf32>
    %254 = arith.mulf %250, %250 : vector<1x128xf32>
    %255 = arith.subf %253, %254 : vector<1x128xf32>
    %256 = vector.broadcast %250 : vector<1x128xf32> to vector<32x128xf32>
    %257 = arith.subf %232, %256 : vector<32x128xf32>
    %cst_129 = arith.constant 9.99999974E-6 : f32
    %258 = vector.broadcast %cst_129 : f32 to vector<1x128xf32>
    %259 = arith.addf %255, %258 : vector<1x128xf32>
    %260 = math.rsqrt %259 : vector<1x128xf32>
    %261 = arith.mulf %260, %195 : vector<1x128xf32>
    %262 = vector.broadcast %261 : vector<1x128xf32> to vector<32x128xf32>
    %263 = arith.mulf %257, %262 : vector<32x128xf32>
    %264 = vector.broadcast %196 : vector<1x128xf32> to vector<32x128xf32>
    %265 = arith.addf %263, %264 : vector<32x128xf32>
    %cst_130 = arith.constant 0.000000e+00 : f32
    %266 = vector.broadcast %cst_130 : f32 to vector<32x128xf32>
    %267 = arith.cmpf oge, %265, %266 : vector<32x128xf32>
    %cst_131 = arith.constant 0.00999999977 : f32
    %268 = vector.broadcast %cst_131 : f32 to vector<32x128xf32>
    %269 = arith.mulf %268, %265 : vector<32x128xf32>
    %270 = arith.select %267, %265, %269 : vector<32x128xi1>, vector<32x128xf32>
    %c0_132 = arith.constant 0 : index
    %c0_133 = arith.constant 0 : index
    %271 = vector.load %arg19[%c0_132, %c0_133] : memref<384x48xf32, #tpu.memory_space<vmem>>, vector<384x48xf32>
    %c0_134 = arith.constant 0 : index
    %c0_135 = arith.constant 0 : index
    %272 = vector.load %arg20[%c0_134, %c0_135] : memref<1x48xf32, #tpu.memory_space<vmem>>, vector<1x48xf32>
    %273 = tpu.iota {dimensions = array<i32: 0>} : vector<32x32xi32>
    %274 = tpu.iota {dimensions = array<i32: 1>} : vector<32x32xi32>
    %c1_i32_136 = arith.constant 1 : i32
    %275 = vector.broadcast %c1_i32_136 : i32 to vector<32x32xi32>
    %276 = arith.subi %273, %275 : vector<32x32xi32>
    %277 = arith.cmpi eq, %274, %276 : vector<32x32xi32>
    %c15_i32_137 = arith.constant 15 : i32
    %278 = vector.broadcast %c15_i32_137 : i32 to vector<32x32xi32>
    %279 = arith.andi %273, %278 : vector<32x32xi32>
    %c0_i32_138 = arith.constant 0 : i32
    %280 = vector.broadcast %c0_i32_138 : i32 to vector<32x32xi32>
    %281 = arith.cmpi ne, %279, %280 : vector<32x32xi32>
    %282 = arith.andi %277, %281 : vector<32x32xi1>
    %cst_139 = arith.constant 1.000000e+00 : f32
    %cst_140 = arith.constant 0.000000e+00 : f32
    %283 = vector.broadcast %cst_139 : f32 to vector<32x32xf32>
    %284 = vector.broadcast %cst_140 : f32 to vector<32x32xf32>
    %285 = arith.select %282, %283, %284 : vector<32x32xi1>, vector<32x32xf32>
    %cst_141 = arith.constant dense<0.000000e+00> : vector<32x128xf32>
    %286 = tpu.matmul %285, %270, %cst_141 {dimension_numbers = #tpu.dot_dimension_numbers<[1], [0], [0], [1], [0, 0, 1, 1], [], []>} : vector<32x32xf32>, vector<32x128xf32>, vector<32x128xf32> -> vector<32x128xf32>
    %287 = tpu.iota {dimensions = array<i32: 0>} : vector<32x32xi32>
    %288 = tpu.iota {dimensions = array<i32: 1>} : vector<32x32xi32>
    %c1_i32_142 = arith.constant 1 : i32
    %289 = vector.broadcast %c1_i32_142 : i32 to vector<32x32xi32>
    %290 = arith.addi %287, %289 : vector<32x32xi32>
    %291 = arith.cmpi eq, %288, %290 : vector<32x32xi32>
    %c15_i32_143 = arith.constant 15 : i32
    %292 = vector.broadcast %c15_i32_143 : i32 to vector<32x32xi32>
    %293 = arith.andi %288, %292 : vector<32x32xi32>
    %c0_i32_144 = arith.constant 0 : i32
    %294 = vector.broadcast %c0_i32_144 : i32 to vector<32x32xi32>
    %295 = arith.cmpi ne, %293, %294 : vector<32x32xi32>
    %296 = arith.andi %291, %295 : vector<32x32xi1>
    %cst_145 = arith.constant 1.000000e+00 : f32
    %cst_146 = arith.constant 0.000000e+00 : f32
    %297 = vector.broadcast %cst_145 : f32 to vector<32x32xf32>
    %298 = vector.broadcast %cst_146 : f32 to vector<32x32xf32>
    %299 = arith.select %296, %297, %298 : vector<32x32xi1>, vector<32x32xf32>
    %cst_147 = arith.constant dense<0.000000e+00> : vector<32x128xf32>
    %300 = tpu.matmul %299, %270, %cst_147 {dimension_numbers = #tpu.dot_dimension_numbers<[1], [0], [0], [1], [0, 0, 1, 1], [], []>} : vector<32x32xf32>, vector<32x128xf32>, vector<32x128xf32> -> vector<32x128xf32>
    %301 = tpu.concatenate %286, %270, %300 in 1 : vector<32x128xf32>, vector<32x128xf32>, vector<32x128xf32> -> vector<32x384xf32>
    %cst_148 = arith.constant dense<0.000000e+00> : vector<32x48xf32>
    %302 = tpu.matmul %301, %271, %cst_148 {dimension_numbers = #tpu.dot_dimension_numbers<[1], [0], [0], [1], [0, 0, 1, 1], [], []>} : vector<32x384xf32>, vector<384x48xf32>, vector<32x48xf32> -> vector<32x48xf32>
    %303 = vector.broadcast %272 : vector<1x48xf32> to vector<32x48xf32>
    %304 = arith.addf %302, %303 : vector<32x48xf32>
    %305 = math.tanh %304 : vector<32x48xf32>
    %c0_149 = arith.constant 0 : index
    %c0_150 = arith.constant 0 : index
    %306 = vector.load %arg21[%c0_149, %c0_150] : memref<32x48xf32, #tpu.memory_space<vmem>>, vector<32x48xf32>
    tpu.vector_store %arg21[%c0_149, %c0_150], %305 {strides = array<i32>} : memref<32x48xf32, #tpu.memory_space<vmem>>, vector<32x48xf32>,
    return
  }
}

</mosaic_0001>

<bundles_post_ra>
// kernel: forward.1
= control target key start
LH: loop header
LB: loop body
LE: loop exit
PB: predicated region body
PF: predicated region fallthrough
CT: control target
= control target key end

     0   :  { %v4196_v0 = vmov 0.0|0.0   ;;  %vm4197_vm0 = vmmov 0   ;;  %v4198_v8 = vmov 0.0   ;;  %v262_v58 = vlaneseq  ;;  %s4199_s22 = smov 64   ;;  %s5335_s3 = inlined_call_operand.vmem [shape: f32[128,64], index: 3, kind: input, shape index: {}]   ;;  %s5336_s4 = inlined_call_operand.vmem [shape: f32[128,64], index: 4, kind: input, shape index: {}]   ;;  %s5337_s1 = inlined_call_operand.vmem [shape: f32[2,128], index: 1, kind: input, shape index: {}]   ;;  %s5338_s2 = inlined_call_operand.vmem [shape: f32[2,128], index: 2, kind: input, shape index: {}]   ;;  %s5339_s0 = inlined_call_operand.vmem [shape: f32[2,128], index: 0, kind: input, shape index: {}]   ;;  %s5340_s5 = inlined_call_operand.vmem [shape: f32[1,64], index: 5, kind: input, shape index: {}]   ;;  %s5341_s6 = inlined_call_operand.vmem [shape: f32[1,64], index: 6, kind: input, shape index: {}]   ;;  %s5342_s7 = inlined_call_operand.vmem [shape: f32[64,64], index: 7, kind: input, shape index: {}]   ;;  %s5343_s8 = inlined_call_operand.vmem [shape: f32[128,64], index: 8, kind: input, shape index: {}]   ;;  %s5344_s9 = inlined_call_operand.vmem [shape: f32[1,64], index: 9, kind: input, shape index: {}]   ;;  %s5345_s10 = inlined_call_operand.vmem [shape: f32[1,64], index: 10, kind: input, shape index: {}]   ;;  %s5346_s11 = inlined_call_operand.vmem [shape: f32[64,64], index: 11, kind: input, shape index: {}]   ;;  %s5347_s12 = inlined_call_operand.vmem [shape: f32[128,64], index: 12, kind: input, shape index: {}]   ;;  %s5348_s13 = inlined_call_operand.vmem [shape: f32[1,64], index: 13, kind: input, shape index: {}]   ;;  %s5349_s14 = inlined_call_operand.vmem [shape: f32[1,64], index: 14, kind: input, shape index: {}]   ;;  %s5350_s15 = inlined_call_operand.vmem [shape: f32[64,128], index: 15, kind: input, shape index: {}]   ;;  %s5351_s16 = inlined_call_operand.vmem [shape: f32[128,128], index: 16, kind: input, shape index: {}]   ;;  %s5352_s19 = inlined_call_operand.vmem [shape: f32[384,48], index: 19, kind: input, shape index: {}]   ;;  %s5353_s17 = inlined_call_operand.vmem [shape: f32[1,128], index: 17, kind: input, shape index: {}]   ;;  %s5354_s18 = inlined_call_operand.vmem [shape: f32[1,128], index: 18, kind: input, shape index: {}]   ;;  %s5355_s20 = inlined_call_operand.vmem [shape: f32[1,48], index: 20, kind: input, shape index: {}]   ;;  %s5356_s21 = inlined_call_operand.vmem [shape: f32[32,48], index: 21, kind: output, shape index: {}]  }
   0x1   :  { %5359 = sst [smem:[#allocation2_spill]] %s5335_s3  ;;  %3805 = vmatprep.subr.bf16.mxu0 %v4196_v0  ;;  %3829 = vmatprep.subr.bf16.mxu1 %v4196_v0  ;;  %vm276_vm3 = vcmask 1041408   ;;  %vm272_vm4 = vcmask 15360   ;;  %vm462_vm8 = vcmask 1043456   ;;  %vm458_vm9 = vcmask 31744  }
   0x2   :  { %5360 = sst [smem:[#allocation3_spill]] %s5336_s4  ;;  %s5365_s26 = sld [smem:[#allocation2_spill]]  ;;  %3326 = vmatprep.mubr.msk.f32.mxu0 %vm4197_vm0, %v4198_v8  ;;  %3361 = vmatprep.mubr.msk.f32.mxu1 %vm4197_vm0, %v4198_v8  ;;  %v4442_v59 = vand.u32 127, %v262_v58  ;;  %v4447_v61 = vshrl.u32 %v262_v58, 7  ;;  %vm536_vm10 = vcmask 523264  }
   0x3   :  { %5361 = sst [smem:[#allocation4_spill]] %s5337_s1  ;;  %s5366_s29 = sld [smem:[#allocation3_spill]] }
   0x4   :  { %5362 = sst [smem:[#allocation5_spill]] %s5338_s2  ;;  %v4445_v60 = vmul.u32 2, %v4442_v59 }
   0x5   :  { %5363 = sst [smem:[#allocation6_spill]] %s5339_s0  ;;  %s5368_s1 = sld [smem:[#allocation5_spill]] }
   0x6   :  { %5364 = sst [smem:[#allocation7_spill]] %s5340_s5  ;;  %s5367_s5 = sld [smem:[#allocation4_spill]]  ;;  %v4450_v62 = vadd.s32 1, %v4445_v60  ;;  %vm267_vm1 = vcmp.eq.s32.totalorder %v4447_v61, %v4445_v60 }
   0x8   :  { %v71_v1 = vld [vmem:[%s5365_s26] sm:$0xff]  ;;  %v72_v2 = vld [vmem:[%s5365_s26 + $0x8] sm:$0xff]  ;;  %v73_v6 = vld [vmem:[%s5365_s26 + $0x10] sm:$0xff]  ;;  %vm270_vm2 = vcmp.eq.s32.totalorder %v4447_v61, %v4450_v62 }
   0x9   :  { %v87_v3 = vld [vmem:[%s5366_s29] sm:$0xff]  ;;  %v3806_v4 = vpack.c.bf16 %v72_v2, %v71_v1  ;;  %v88_v5 = vld [vmem:[%s5366_s29 + $0x8] sm:$0xff]  ;;  %v74_v7 = vld [vmem:[%s5365_s26 + $0x18] sm:$0xff] }
   0xa   :  { %v3830_v9 = vpack.c.bf16 %v88_v5, %v87_v3  ;;  %v89_v10 = vld [vmem:[%s5366_s29 + $0x10] sm:$0xff]  ;;  %v90_v11 = vld [vmem:[%s5366_s29 + $0x18] sm:$0xff]  ;;  %v3809_v12 = vpack.c.bf16 %v74_v7, %v73_v6  ;;  %v75_v14 = vld [vmem:[%s5365_s26 + $0x20] sm:$0xff]  ;;  %v4463_v6 = vsel %vm267_vm1, 1.0, %v4198_v8 }
   0xb   :  { %3807 = vmatpush3.bf16.msra.mxu0 %v3806_v4  ;;  %v3833_v13 = vpack.c.bf16 %v90_v11, %v89_v10  ;;  %v76_v15 = vld [vmem:[%s5365_s26 + $0x28] sm:$0xff]  ;;  %v91_v16 = vld [vmem:[%s5366_s29 + $0x20] sm:$0xff]  ;;  %v77_v20 = vld [vmem:[%s5365_s26 + $0x30] sm:$0xff]  ;;  %v4466_v10 = vsel %vm270_vm2, 1.0, %v4198_v8  ;;  %v4477_v11 = vadd.s32 1, %v4447_v61 }
   0xc   :  { %3831 = vmatpush3.bf16.msra.mxu1 %v3830_v9  ;;  %3808 = vmatprep.subr.bf16.mxu0 %v4196_v0  ;;  %v92_v17 = vld [vmem:[%s5366_s29 + $0x28] sm:$0xff]  ;;  %v3812_v18 = vpack.c.bf16 %v76_v15, %v75_v14  ;;  %v78_v21 = vld [vmem:[%s5365_s26 + $0x38] sm:$0xff]  ;;  %v93_v22 = vld [vmem:[%s5366_s29 + $0x30] sm:$0xff] }
   0xd   :  { %3832 = vmatprep.subr.bf16.mxu1 %v4196_v0  ;;  %v3836_v19 = vpack.c.bf16 %v92_v17, %v91_v16  ;;  %v94_v23 = vld [vmem:[%s5366_s29 + $0x38] sm:$0xff]  ;;  %v3815_v24 = vpack.c.bf16 %v78_v21, %v77_v20  ;;  %v69_v25 = vld [vmem:[%s5367_s5] sm:$0x3]  ;;  %v80_v28 = vld [vmem:[%s5365_s26 + $0x48] sm:$0xff]  ;;  %s5370_s5 = sld [smem:[#allocation7_spill]]  ;;  %vm453_vm5 = vcmp.eq.s32.totalorder %v4442_v59, %v4477_v11 }
   0xe   :  { %v3839_v26 = vpack.c.bf16 %v94_v23, %v93_v22  ;;  %v79_v27 = vld [vmem:[%s5365_s26 + $0x40] sm:$0xff]  ;;  %v105_v29 = vmul.f32 0.5, %v69_v25  ;;  %v96_v31 = vld [vmem:[%s5366_s29 + $0x48] sm:$0xff]  ;;  %v81_v35 = vld [vmem:[%s5365_s26 + $0x50] sm:$0xff] }
   0xf   :  { %3810 = vmatpush3.bf16.msra.mxu0 %v3809_v12  ;;  %v95_v30 = vld [vmem:[%s5366_s29 + $0x40] sm:$0xff]  ;;  %v3818_v33 = vpack.c.bf16 %v80_v28, %v79_v27  ;;  %v82_v36 = vld [vmem:[%s5365_s26 + $0x58] sm:$0xff]  ;;  %v97_v37 = vld [vmem:[%s5366_s29 + $0x50] sm:$0xff]  ;;  %v454_v12 = vand.u32 1, %v4442_v59 }
  0x10   :  { %3834 = vmatpush3.bf16.msra.mxu1 %v3833_v13  ;;  %3811 = vmatprep.subr.bf16.mxu0 %v4196_v0  ;;  %v106_v32 = vmul.f32 1.442695, %v105_v29  ;;  %v3842_v34 = vpack.c.bf16 %v96_v31, %v95_v30  ;;  %v98_v38 = vld [vmem:[%s5366_s29 + $0x58] sm:$0xff]  ;;  %v3821_v39 = vpack.c.bf16 %v82_v36, %v81_v35  ;;  %v83_v41 = vld [vmem:[%s5365_s26 + $0x60] sm:$0xff]  ;;  %v84_v42 = vld [vmem:[%s5365_s26 + $0x68] sm:$0xff] }
  0x11   :  { %3835 = vmatprep.subr.bf16.mxu1 %v4196_v0  ;;  %v3845_v40 = vpack.c.bf16 %v98_v38, %v97_v37  ;;  %v99_v43 = vld [vmem:[%s5366_s29 + $0x60] sm:$0xff]  ;;  %v100_v44 = vld [vmem:[%s5366_s29 + $0x68] sm:$0xff]  ;;  %v3824_v45 = vpack.c.bf16 %v84_v42, %v83_v41  ;;  %v85_v47 = vld [vmem:[%s5365_s26 + $0x70] sm:$0xff]  ;;  %vm455_vm6 = vcmp.ne.s32.totalorder %v454_v12, 0 }
  0x12   :  { %4180 = vpow2.f32 %v106_v32  ;;  %v3848_v46 = vpack.c.bf16 %v100_v44, %v99_v43  ;;  %v86_v48 = vld [vmem:[%s5365_s26 + $0x78] sm:$0xff]  ;;  %v70_v49 = vld [vmem:[%s5368_s1] sm:$0x3]  ;;  %v101_v50 = vld [vmem:[%s5366_s29 + $0x70] sm:$0xff]  ;;  %s5369_s26 = sld [smem:[#allocation6_spill]] }
  0x13   :  { %3813 = vmatpush3.bf16.msra.mxu0 %v3812_v18  ;;  %v102_v51 = vld [vmem:[%s5366_s29 + $0x78] sm:$0xff]  ;;  %v3827_v53 = vpack.c.bf16 %v86_v48, %v85_v47  ;;  %v2881_v63 = vld [vmem:[%s5370_s5] ss:$0 sm:$0xff]  ;;  %vm456_vm7 = vmand %vm453_vm5, %vm455_vm6 }
  0x14   :  { %3837 = vmatpush3.bf16.msra.mxu1 %v3836_v19  ;;  %3814 = vmatprep.subr.bf16.mxu0 %v4196_v0  ;;  %v3851_v56 = vpack.c.bf16 %v102_v51, %v101_v50  ;;  %v2882_v1 = vld [vmem:[%s5341_s6] ss:$0 sm:$0xff]  ;;  %v427_v14 = vld [vmem:[%s5342_s7 + $0x8] sm:$0xff]  ;;  %v457_v20 = vsel %vm456_vm7, 1.0, %v4198_v8  ;;  %v428_v22 = vld [vmem:[%s5342_s7 + $0x10] sm:$0xff] }
  0x15   :  { %3838 = vmatprep.subr.bf16.mxu1 %v4196_v0  ;;  %v426_v13 = vld [vmem:[%s5342_s7] sm:$0xff]  ;;  %v429_v23 = vld [vmem:[%s5342_s7 + $0x18] sm:$0xff]  ;;  %v432_v28 = vld [vmem:[%s5342_s7 + $0x30] sm:$0xff] }
  0x16   :  { %v3854_v21 = vpack.c.bf16 %v427_v14, %v426_v13  ;;  %v430_v25 = vld [vmem:[%s5342_s7 + $0x20] sm:$0xff]  ;;  %v433_v29 = vld [vmem:[%s5342_s7 + $0x38] sm:$0xff]  ;;  %v435_v32 = vld [vmem:[%s5343_s8 + $0x8] sm:$0xff]  ;;  %v4622_v14 = vadd.s32 16, %v4447_v61 }
  0x17   :  { %3816 = vmatpush3.bf16.msra.mxu0 %v3815_v24  ;;  %v3857_v24 = vpack.c.bf16 %v429_v23, %v428_v22  ;;  %v3863_v30 = vpack.c.bf16 %v433_v29, %v432_v28  ;;  %v434_v31 = vld [vmem:[%s5343_s8] sm:$0xff]  ;;  %v437_v35 = vld [vmem:[%s5343_s8 + $0x18] sm:$0xff]  ;;  %v439_v38 = vld [vmem:[%s5343_s8 + $0x28] sm:$0xff]  ;;  %v4648_v22 = vadd.s32 48, %v4447_v61  ;;  %v4651_v23 = vadd.s32 56, %v4447_v61 }
  0x18   :  { %3840 = vmatpush3.bf16.msra.mxu1 %v3839_v26  ;;  %3817 = vmatprep.subr.bf16.mxu0 %v4196_v0  ;;  %v68_v54 = vld [vmem:[%s5369_s26] sm:$0x3]  ;;  %v431_v26 = vld [vmem:[%s5342_s7 + $0x28] sm:$0xff]  ;;  %v441_v41 = vld [vmem:[%s5343_s8 + $0x38] sm:$0xff] }
  0x19   :  { %3841 = vmatprep.subr.bf16.mxu1 %v4196_v0  ;;  %v3860_v27 = vpack.c.bf16 %v431_v26, %v430_v25  ;;  %v438_v37 = vld [vmem:[%s5343_s8 + $0x20] sm:$0xff]  ;;  %v443_v44 = vld [vmem:[%s5343_s8 + $0x48] sm:$0xff]  ;;  %v445_v47 = vld [vmem:[%s5343_s8 + $0x58] sm:$0xff]  ;;  %v848_v25 = vand.u32 15, %v4651_v23 }
  0x1a   :  { %v442_v43 = vld [vmem:[%s5343_s8 + $0x40] sm:$0xff]  ;;  %v447_v50 = vld [vmem:[%s5343_s8 + $0x68] sm:$0xff] }
  0x1b   :  { %3819 = vmatpush3.bf16.msra.mxu0 %v3818_v33  ;;  %v436_v33 = vld [vmem:[%s5343_s8 + $0x10] sm:$0xff] }
  0x1c   :  { %3843 = vmatpush3.bf16.msra.mxu1 %v3842_v34  ;;  %3820 = vmatprep.subr.bf16.mxu0 %v4196_v0  ;;  %v4181_v52 = vpop.eup %4180  ;;  %v3866_v34 = vpack.c.bf16 %v435_v32, %v434_v31  ;;  %v3869_v36 = vpack.c.bf16 %v437_v35, %v436_v33 }
  0x1d   :  { %3844 = vmatprep.subr.bf16.mxu1 %v4196_v0  ;;  %v108_v55 = vmul.f32 %v4181_v52, %v70_v49  ;;  %v446_v49 = vld [vmem:[%s5343_s8 + $0x60] sm:$0xff]  ;;  %v448_v52 = vld [vmem:[%s5343_s8 + $0x70] sm:$0xff] }
  0x1e   :  { %v3884_v51 = vpack.c.bf16 %v447_v50, %v446_v49 }
  0x1f   :  { %3822 = vmatpush3.bf16.msra.mxu0 %v3821_v39  ;;  %v109_v57 = vadd.f32 %v108_v55, %v68_v54  ;;  %v3872_v39 = vpack.c.bf16 %v439_v38, %v438_v37 }
  0x20   :  { %3846 = vmatpush3.bf16.msra.mxu1 %v3845_v40  ;;  %3823 = vmatprep.subr.bf16.mxu0 %v4196_v0  ;;  %v440_v40 = vld [vmem:[%s5343_s8 + $0x30] sm:$0xff] }
  0x21   :  { %3847 = vmatprep.subr.bf16.mxu1 %v4196_v0  ;;  %v3875_v42 = vpack.c.bf16 %v441_v41, %v440_v40 }
  0x23   :  { %3825 = vmatpush3.bf16.msra.mxu0 %v3824_v45  ;;  %v3878_v45 = vpack.c.bf16 %v443_v44, %v442_v43  ;;  %v4674_v43 = vsub.s32 0, %v4447_v61 }
  0x24   :  { %3849 = vmatpush3.bf16.msra.mxu1 %v3848_v46  ;;  %3826 = vmatprep.subr.bf16.mxu0 %v4196_v0  ;;  %v444_v46 = vld [vmem:[%s5343_s8 + $0x50] sm:$0xff] }
  0x25   :  { %3850 = vmatprep.subr.bf16.mxu1 %v4196_v0  ;;  %v3881_v48 = vpack.c.bf16 %v445_v47, %v444_v46 }
  0x27   :  { %3828 = vmatpush3.bf16.msra.mxu0 %v3827_v53  ;;  %v449_v53 = vld [vmem:[%s5343_s8 + $0x78] sm:$0xff] }
  0x28   :  { %3852 = vmatpush3.bf16.msra.mxu1 %v3851_v56  ;;  %3369 = vmatprep.subr.mxu0 %v4198_v8  ;;  %v3887_v54 = vpack.c.bf16 %v449_v53, %v448_v52 }
  0x29   :  { %3364 = vmatprep.subr.mxu1 %v4198_v8 }
  0x2a   :  { %3327 = vmatmul.mubr.f32.vlgmr.msra.gmra.mrb[0].mxu0 %v109_v57 }
  0x2b   :  { %3362 = vmatmul.mubr.f32.vlgmr.msra.gmra.mrb[0].mxu1 %v109_v57  ;;  %3371 = vmatprep.mubr.msk.f32.mxu0 %vm4197_vm0, %v4198_v8 }
  0x2c   :  { %3366 = vmatprep.mubr.msk.f32.mxu1 %vm4197_vm0, %v4198_v8 }
  0xfd   :  { %v182_v2 = vpop.f32.mrb[0].mxu0 }
  0xfe   :  { %v183_v3 = vadd.f32 %v2881_v63, %v182_v2  ;;  %v258_v4 = vpop.f32.mrb[0].mxu1  ;;  %v3328_v5 = vpop.f32.mrb[1].mxu0  ;;  %v4588_v2 = vadd.s32 8, %v4447_v61 }
  0xff   :  { %v259_v7 = vadd.f32 %v2882_v1, %v258_v4  ;;  %v3363_v9 = vpop.f32.mrb[1].mxu1  ;;  %v4592_v4 = vand.u32 15, %v4442_v59 }
 0x100   :  { %3370 = vmatpush3.msk.msra.mxu0 %vm276_vm3, %v183_v3  ;;  %v841_v3 = vand.u32 15, %v4447_v61  ;;  %v842_v5 = vand.u32 15, %v4588_v2  ;;  %v4200_v9 = vmov 1.0|1.0  }
 0x101   :  { %3365 = vmatpush3.msk.msra.mxu1 %vm276_vm3, %v259_v7  ;;  %3372 = vmatmul.mubr.msk.f32.vlgmr.msra.gmra.mrb[2].mxu0 %vm272_vm4, %v4463_v6  ;;  %vm857_vm7 = vcmp.eq.s32.totalorder %v848_v25, %v4592_v4  ;;  %v1057_v25 = vld [vmem:[%s5346_s11 + $0x10] sm:$0xff] }
 0x102   :  { %3367 = vmatmul.mubr.msk.f32.vlgmr.msra.gmra.mrb[2].mxu1 %vm272_vm4, %v4466_v10  ;;  %3374 = vmatprep.subr.mxu1 %v4198_v8  ;;  %vm4598_vm11 = vcmp.eq.s32.totalorder %v841_v3, %v4592_v4  ;;  %vm851_vm12 = vcmp.eq.s32.totalorder %v842_v5, %v4592_v4 }
 0x103   :  { %3376 = vmatprep.mubr.msk.f32.mxu1 %vm4197_vm0, %v4198_v8  ;;  %3865 = vmatprep.subr.bf16.mxu0 %v4196_v0  ;;  %vm3890_vm13 = vmpackc.low %vm851_vm12, %vm4598_vm11 }
 0x104   :  { %3430 = vmatprep.mubr.msk.f32.mxu0 %vm4197_vm0, %v4198_v8  ;;  %3867 = vmatpush3.bf16.msra.mxu0 %v3866_v34 }
 0x105   :  { %3868 = vmatprep.subr.bf16.mxu0 %v4196_v0 }
 0x108   :  { %3870 = vmatpush3.bf16.msra.mxu0 %v3869_v36 }
 0x109   :  { %3871 = vmatprep.subr.bf16.mxu0 %v4196_v0 }
 0x10c   :  { %3873 = vmatpush3.bf16.msra.mxu0 %v3872_v39 }
 0x10d   :  { %3874 = vmatprep.subr.bf16.mxu0 %v4196_v0 }
 0x110   :  { %3876 = vmatpush3.bf16.msra.mxu0 %v3875_v42 }
 0x111   :  { %3877 = vmatprep.subr.bf16.mxu0 %v4196_v0 }
 0x114   :  { %3879 = vmatpush3.bf16.msra.mxu0 %v3878_v45 }
 0x115   :  { %3880 = vmatprep.subr.bf16.mxu0 %v4196_v0 }
 0x118   :  { %3882 = vmatpush3.bf16.msra.mxu0 %v3881_v48 }
 0x119   :  { %3883 = vmatprep.subr.bf16.mxu0 %v4196_v0 }
 0x11c   :  { %3885 = vmatpush3.bf16.msra.mxu0 %v3884_v51 }
 0x11d   :  { %3886 = vmatprep.subr.bf16.mxu0 %v4196_v0 }
 0x120   :  { %3888 = vmatpush3.bf16.msra.mxu0 %v3887_v54 }
 0x121   :  { %3901 = vmatprep.subr.bf16.mxu0 %v4196_v0 }
 0x1d4   :  { %v422_v15 = vpop.f32.mrb[2].mxu0 }
 0x1d5   :  { %v346_v16 = vpop.f32.mrb[2].mxu1  ;;  %v3373_v17 = vpop.f32.mrb[3].mxu0 }
 0x1d6   :  { %v4491_v18 = vadd.f32 %v422_v15, %v346_v16  ;;  %v3368_v19 = vpop.f32.mrb[3].mxu1  ;;  %v4625_v15 = vadd.s32 24, %v4447_v61  ;;  %v843_v16 = vand.u32 15, %v4622_v14 }
 0x1d7   :  { %v4637_v19 = vadd.s32 40, %v4447_v61 }
 0x1d8   :  { %3375 = vmatpush3.msk.msra.mxu1 %vm462_vm8, %v4491_v18  ;;  %v844_v17 = vand.u32 15, %v4625_v15  ;;  %vm852_vm14 = vcmp.eq.s32.totalorder %v843_v16, %v4592_v4 }
 0x1d9   :  { %3377 = vmatmul.mubr.msk.f32.vlgmr.msra.gmra.mrb[4].mxu1 %vm458_vm9, %v457_v20  ;;  %3853 = vmatprep.subr.bf16.mxu1 %v4196_v0 }
 0x1da   :  { %3855 = vmatpush3.bf16.msra.mxu1 %v3854_v21  ;;  %3395 = vmatprep.mubr.msk.f32.mxu1 %vm4197_vm0, %v4198_v8  ;;  %vm853_vm15 = vcmp.eq.s32.totalorder %v844_v17, %v4592_v4  ;;  %v846_v21 = vand.u32 15, %v4637_v19 }
 0x1db   :  { %3856 = vmatprep.subr.bf16.mxu1 %v4196_v0  ;;  %vm3893_vm1 = vmpackc.low %vm853_vm15, %vm852_vm14  ;;  %vm1309_vm14 = vcmp.eq.s32.totalorder %v4588_v2, %v4450_v62  ;;  %vm1307_vm15 = vcmp.eq.s32.totalorder %v4588_v2, %v4445_v60 }
 0x1dc   :  { %vm855_vm3 = vcmp.eq.s32.totalorder %v846_v21, %v4592_v4 }
 0x1de   :  { %3858 = vmatpush3.bf16.msra.mxu1 %v3857_v24  ;;  %v847_v24 = vand.u32 15, %v4648_v22 }
 0x1df   :  { %3859 = vmatprep.subr.bf16.mxu1 %v4196_v0 }
 0x1e0   :  { %vm856_vm6 = vcmp.eq.s32.totalorder %v847_v24, %v4592_v4 }
 0x1e2   :  { %3861 = vmatpush3.bf16.msra.mxu1 %v3860_v27 }
 0x1e3   :  { %3862 = vmatprep.subr.bf16.mxu1 %v4196_v0 }
 0x1e6   :  { %3864 = vmatpush3.bf16.msra.mxu1 %v3863_v30 }
 0x1e7   :  { %3433 = vmatprep.subr.mxu1 %v4198_v8 }
 0x1e9   :  { %3396 = vmatmul.mubr.msk.f32.vlgmr.msra.gmra.mrb[6].mxu1 %vm536_vm10, %v4491_v18 }
 0x1ea   :  { %3435 = vmatprep.mubr.msk.f32.mxu1 %vm4197_vm0, %v4198_v8 }
 0x2ac   :  { %v532_v55 = vpop.f32.mrb[4].mxu1 }
 0x2ad   :  { %610 = vrot.lane.b32.xlu0 %v532_v55, %s4199_s22  ;;  %v3378_v56 = vpop.f32.mrb[5].mxu1  ;;  %v450_v55 = vld [vmem:[%s5344_s9] sm:$0x1] }
 0x2bc   :  { %v605_v57 = vpop.f32.mrb[6].mxu1 }
 0x2bd   :  { %v3397_v58 = vpop.f32.mrb[7].mxu1 }
 0x31f   :  { %v611_v63 = vpop.permute.xlu0 %610 }
 0x320   :  { %v613_v1 = vsel %vm536_vm10, %v4491_v18, %v611_v63  ;;  %v4634_v18 = vadd.s32 32, %v4447_v61 }
 0x321   :  { %3431 = vmatmul.mubr.f32.vlgmr.msra.gmra.mrb[4].mxu0 %v613_v1  ;;  %v2912_v1 = vld [vmem:[%s5345_s10] ss:$0 sm:$0xff] }
 0x322   :  { %3478 = vmatprep.mubr.msk.f32.mxu0 %vm4197_vm0, %v4198_v8  ;;  %3903 = vmatpush3.bf16.msk.msra.mxu0 %vm3890_vm13, %v4200_v9  ;;  %v845_v20 = vand.u32 15, %v4634_v18 }
 0x323   :  { %3904 = vmatprep.subr.bf16.mxu0 %v4196_v0 }
 0x324   :  { %vm854_vm2 = vcmp.eq.s32.totalorder %v845_v20, %v4592_v4 }
 0x325   :  { %vm3896_vm4 = vmpackc.low %vm855_vm3, %vm854_vm2 }
 0x326   :  { %3906 = vmatpush3.bf16.msk.msra.mxu0 %vm3893_vm1, %v4200_v9 }
 0x327   :  { %3907 = vmatprep.subr.bf16.mxu0 %v4196_v0 }
 0x32a   :  { %3909 = vmatpush3.bf16.msk.msra.mxu0 %vm3896_vm4, %v4200_v9 }
 0x32b   :  { %3910 = vmatprep.subr.bf16.mxu0 %v4196_v0 }
 0x3f4   :  { %v680_v12 = vpop.f32.mrb[4].mxu0 }
 0x3f5   :  { %v3432_v13 = vpop.f32.mrb[5].mxu0  ;;  %3434 = vmatpush3.msk.msra.mxu1 %vm462_vm8, %v680_v12  ;;  %v1055_v12 = vld [vmem:[%s5346_s11] sm:$0xff] }
 0x3f6   :  { %3436 = vmatmul.mubr.msk.f32.vlgmr.msra.gmra.mrb[8].mxu1 %vm458_vm9, %v4466_v10  ;;  %3438 = vmatprep.subr.mxu1 %v4198_v8  ;;  %v1056_v13 = vld [vmem:[%s5346_s11 + $0x8] sm:$0xff] }
 0x3f7   :  { %3439 = vmatpush3.msk.msra.mxu1 %vm462_vm8, %v605_v57  ;;  %3440 = vmatprep.mubr.msk.f32.mxu1 %vm4197_vm0, %v4198_v8  ;;  %vm3899_vm8 = vmpackc.low %vm857_vm7, %vm856_vm6  ;;  %v1081_v57 = vand.u32 3, %v4442_v59  ;;  %v3914_v21 = vpack.c.bf16 %v1056_v13, %v1055_v12 }
 0x3f8   :  { %3889 = vmatprep.subr.bf16.mxu1 %v4196_v0  ;;  %3912 = vmatpush3.bf16.msk.msra.mxu0 %vm3899_vm8, %v4200_v9 }
 0x3f9   :  { %3925 = vmatprep.subr.bf16.mxu0 %v4196_v0 }
 0x3fe   :  { %3441 = vmatmul.mubr.msk.f32.vlgmr.msra.gmra.mrb[8].mxu1 %vm458_vm9, %v4463_v6  ;;  %vm1082_vm9 = vcmp.ne.s32.totalorder %v1081_v57, 0  ;;  %v1078_v57 = vld [vmem:[%s5347_s12 + $0x78] sm:$0xff] }
 0x3ff   :  { %3891 = vmatpush3.bf16.msk.msra.mxu1 %vm3890_vm13, %v4200_v9  ;;  %3459 = vmatprep.mubr.msk.f32.mxu1 %vm4197_vm0, %v4198_v8  ;;  %vm1083_vm11 = vmand %vm453_vm5, %vm1082_vm9  ;;  %vm1085_vm13 = vcmask 64512  }
 0x400   :  { %3892 = vmatprep.subr.bf16.mxu1 %v4196_v0  ;;  %v1084_v20 = vsel %vm1083_vm11, 1.0, %v4198_v8 }
 0x403   :  { %3894 = vmatpush3.bf16.msk.msra.mxu1 %vm3893_vm1, %v4200_v9 }
 0x404   :  { %3895 = vmatprep.subr.bf16.mxu1 %v4196_v0 }
 0x407   :  { %3897 = vmatpush3.bf16.msk.msra.mxu1 %vm3896_vm4, %v4200_v9 }
 0x408   :  { %3898 = vmatprep.subr.bf16.mxu1 %v4196_v0 }
 0x40b   :  { %3900 = vmatpush3.bf16.msk.msra.mxu1 %vm3899_vm8, %v4200_v9 }
 0x40c   :  { %3481 = vmatprep.subr.mxu1 %v4198_v8 }
 0x4d1   :  { %v830_v26 = vpop.f32.mrb[8].mxu1 }
 0x4d2   :  { %v866_v27 = vsel %vm536_vm10, %v830_v26, 0.0  ;;  %v873_v28 = vmul.f32 %v830_v26, %v830_v26  ;;  %v3442_v29 = vpop.f32.mrb[9].mxu1 }
 0x4d3   :  { %v867_v30 = vrot.slane %v866_v27, 4  ;;  %v1060_v29 = vld [vmem:[%s5346_s11 + $0x28] sm:$0xff] }
 0x4d4   :  { %v874_v31 = vsel %vm536_vm10, %v873_v28, 0.0  ;;  %v1059_v28 = vld [vmem:[%s5346_s11 + $0x20] sm:$0xff] }
 0x4d5   :  { %v868_v32 = vadd.f32 %v867_v30, %v866_v27  ;;  %v875_v33 = vrot.slane %v874_v31, 4  ;;  %v3920_v30 = vpack.c.bf16 %v1060_v29, %v1059_v28  ;;  %v1473_v29 = vand.u32 7, %v4622_v14 }
 0x4d7   :  { %v869_v34 = vrot.slane %v868_v32, 2  ;;  %v876_v35 = vadd.f32 %v875_v33, %v874_v31  ;;  %v1061_v31 = vld [vmem:[%s5346_s11 + $0x30] sm:$0xff] }
 0x4d9   :  { %v870_v36 = vadd.f32 %v869_v34, %v868_v32  ;;  %v877_v37 = vrot.slane %v876_v35, 2  ;;  %v1062_v32 = vld [vmem:[%s5346_s11 + $0x38] sm:$0xff]  ;;  %v1063_v34 = vld [vmem:[%s5347_s12] sm:$0xff] }
 0x4da   :  { %v3923_v33 = vpack.c.bf16 %v1062_v32, %v1061_v31  ;;  %v1475_v32 = vand.u32 7, %v4634_v18  ;;  %v1477_v18 = vand.u32 7, %v4648_v22  ;;  %v2177_v31 = vadd.s32 80, %v4447_v61 }
 0x4db   :  { %v871_v38 = vrot.slane %v870_v36, 1  ;;  %v878_v39 = vadd.f32 %v877_v37, %v876_v35  ;;  %v1064_v35 = vld [vmem:[%s5347_s12 + $0x8] sm:$0xff] }
 0x4dc   :  { %v3926_v37 = vpack.c.bf16 %v1064_v35, %v1063_v34  ;;  %v2178_v34 = vadd.s32 88, %v4447_v61  ;;  %v2185_v35 = vand.u32 7, %v2177_v31 }
 0x4dd   :  { %v872_v40 = vadd.f32 %v871_v38, %v870_v36  ;;  %v879_v41 = vrot.slane %v878_v39, 1  ;;  %v1065_v36 = vld [vmem:[%s5347_s12 + $0x10] sm:$0xff]  ;;  %v1066_v38 = vld [vmem:[%s5347_s12 + $0x18] sm:$0xff] }
 0x4df   :  { %v880_v42 = vadd.f32 %v879_v41, %v878_v39  ;;  %3460 = vmatmul.mubr.msk.f32.vlgmr.msra.gmra.mrb[10].mxu1 %vm536_vm10, %v872_v40  ;;  %v3929_v39 = vpack.c.bf16 %v1066_v38, %v1065_v36  ;;  %v1067_v40 = vld [vmem:[%s5347_s12 + $0x20] sm:$0xff]  ;;  %v1068_v41 = vld [vmem:[%s5347_s12 + $0x28] sm:$0xff] }
 0x4e0   :  { %3483 = vmatprep.mubr.msk.f32.mxu1 %vm4197_vm0, %v4198_v8 }
 0x4e1   :  { %3479 = vmatmul.mubr.msk.f32.vlgmr.msra.gmra.mrb[6].mxu0 %vm536_vm10, %v880_v42  ;;  %v3932_v42 = vpack.c.bf16 %v1068_v41, %v1067_v40 }
 0x4e2   :  { %3537 = vmatprep.mubr.msk.f32.mxu0 %vm4197_vm0, %v4198_v8  ;;  %3927 = vmatpush3.bf16.msra.mxu0 %v3926_v37 }
 0x4e3   :  { %3928 = vmatprep.subr.bf16.mxu0 %v4196_v0 }
 0x4e6   :  { %3930 = vmatpush3.bf16.msra.mxu0 %v3929_v39 }
 0x4e7   :  { %3931 = vmatprep.subr.bf16.mxu0 %v4196_v0 }
 0x4ea   :  { %3933 = vmatpush3.bf16.msra.mxu0 %v3932_v42 }
 0x4eb   :  { %3934 = vmatprep.subr.bf16.mxu0 %v4196_v0 }
 0x5b2   :  { %v950_v44 = vpop.f32.mrb[10].mxu1 }
 0x5b3   :  { %v955_v45 = vmul.f32 0.03125, %v950_v44  ;;  %v3461_v46 = vpop.f32.mrb[11].mxu1  ;;  %v1069_v44 = vld [vmem:[%s5347_s12 + $0x30] sm:$0xff] }
 0x5b4   :  { %v1025_v47 = vpop.f32.mrb[6].mxu0 }
 0x5b5   :  { %v1030_v48 = vmul.f32 %v955_v45, %v955_v45  ;;  %v1035_v49 = vrot.slane %v955_v45, %v4674_v43  ;;  %v1029_v50 = vmul.f32 0.03125, %v1025_v47  ;;  %v3480_v51 = vpop.f32.mrb[7].mxu0  ;;  %v1070_v45 = vld [vmem:[%s5347_s12 + $0x38] sm:$0xff]  ;;  %v1071_v47 = vld [vmem:[%s5347_s12 + $0x40] sm:$0xff] }
 0x5b6   :  { %v3935_v46 = vpack.c.bf16 %v1070_v45, %v1069_v44  ;;  %v1074_v51 = vld [vmem:[%s5347_s12 + $0x58] sm:$0xff] }
 0x5b7   :  { %v1036_v52 = vsub.f32 %v830_v26, %v1035_v49  ;;  %v1031_v53 = vsub.f32 %v1029_v50, %v1030_v48  ;;  %v1058_v26 = vld [vmem:[%s5346_s11 + $0x18] sm:$0xff]  ;;  %v1072_v48 = vld [vmem:[%s5347_s12 + $0x48] sm:$0xff]  ;;  %v1073_v50 = vld [vmem:[%s5347_s12 + $0x50] sm:$0xff] }
 0x5b8   :  { %v3917_v27 = vpack.c.bf16 %v1058_v26, %v1057_v25  ;;  %3936 = vmatpush3.bf16.msra.mxu0 %v3935_v46  ;;  %v3938_v49 = vpack.c.bf16 %v1072_v48, %v1071_v47  ;;  %v1471_v25 = vand.u32 7, %v4447_v61  ;;  %v1472_v26 = vand.u32 7, %v4588_v2 }
 0x5b9   :  { %v1037_v54 = vadd.f32 1e-05, %v1031_v53  ;;  %3937 = vmatprep.subr.bf16.mxu0 %v4196_v0  ;;  %v1075_v53 = vld [vmem:[%s5347_s12 + $0x60] sm:$0xff] }
 0x5bb   :  { %4182 = vrsqrt.f32 %v1037_v54  ;;  %v1076_v54 = vld [vmem:[%s5347_s12 + $0x68] sm:$0xff] }
 0x5bc   :  { %3939 = vmatpush3.bf16.msra.mxu0 %v3938_v49 }
 0x5bd   :  { %3940 = vmatprep.subr.bf16.mxu0 %v4196_v0 }
 0x5c5   :  { %v4183_v56 = vpop.eup %4182 }
 0x5c6   :  { %v1039_v58 = vmul.f32 %v4183_v56, %v450_v55  ;;  %v3944_v55 = vpack.c.bf16 %v1076_v54, %v1075_v53  ;;  %v1077_v56 = vld [vmem:[%s5347_s12 + $0x70] sm:$0xff] }
 0x5c8   :  { %v1043_v63 = vrot.slane %v1039_v58, %v4674_v43  ;;  %v3947_v58 = vpack.c.bf16 %v1078_v57, %v1077_v56 }
 0x5ca   :  { %v1044_v5 = vmul.f32 %v1043_v63, %v1036_v52  ;;  %v3941_v52 = vpack.c.bf16 %v1074_v51, %v1073_v50 }
 0x5cc   :  { %v1051_v7 = vadd.f32 %v2912_v1, %v1044_v5  ;;  %3942 = vmatpush3.bf16.msra.mxu0 %v3941_v52 }
 0x5cd   :  { %3943 = vmatprep.subr.bf16.mxu0 %v4196_v0 }
 0x5ce   :  { %vm1052_vm12 = vcmp.ge.f32.partialorder %v1051_v7, 0.0  ;;  %v1053_v17 = vmul.f32 0.01, %v1051_v7 }
 0x5d0   :  { %v4695_v24 = vsel %vm1052_vm12, %v1051_v7, %v1053_v17  ;;  %3945 = vmatpush3.bf16.msra.mxu0 %v3944_v55 }
 0x5d1   :  { %3482 = vmatpush3.msra.mxu1 %v4695_v24  ;;  %3946 = vmatprep.subr.bf16.mxu0 %v4196_v0 }
 0x5d2   :  { %3484 = vmatmul.mubr.msk.f32.vlgmr.msra.gmra.mrb[12].mxu1 %vm1085_vm13, %v1084_v20  ;;  %3913 = vmatprep.subr.bf16.mxu1 %v4196_v0  ;;  %v4791_v20 = vsel %vm1309_vm14, 1.0, %v4198_v8 }
 0x5d3   :  { %3915 = vmatpush3.bf16.msra.mxu1 %v3914_v21  ;;  %3502 = vmatprep.mubr.msk.f32.mxu1 %vm4197_vm0, %v4198_v8 }
 0x5d4   :  { %3916 = vmatprep.subr.bf16.mxu1 %v4196_v0  ;;  %3948 = vmatpush3.bf16.msra.mxu0 %v3947_v58 }
 0x5d5   :  { %3961 = vmatprep.subr.bf16.mxu0 %v4196_v0 }
 0x5d7   :  { %3918 = vmatpush3.bf16.msra.mxu1 %v3917_v27  ;;  %v4810_v27 = vand.u32 7, %v4442_v59 }
 0x5d8   :  { %3919 = vmatprep.subr.bf16.mxu1 %v4196_v0 }
 0x5d9   :  { %vm1480_vm1 = vcmp.eq.s32.totalorder %v1471_v25, %v4810_v27  ;;  %vm1481_vm2 = vcmp.eq.s32.totalorder %v1472_v26, %v4810_v27  ;;  %vm1482_vm4 = vcmp.eq.s32.totalorder %v1473_v29, %v4810_v27  ;;  %vm1484_vm8 = vcmp.eq.s32.totalorder %v1475_v32, %v4810_v27 }
 0x5da   :  { %vm4814_vm3 = vmpackc.low %vm1481_vm2, %vm1480_vm1  ;;  %vm1486_vm12 = vcmp.eq.s32.totalorder %v1477_v18, %v4810_v27  ;;  %vm1729_vm2 = vcmask 130048  }
 0x5db   :  { %3921 = vmatpush3.bf16.msra.mxu1 %v3920_v30  ;;  %v1474_v30 = vand.u32 7, %v4625_v15 }
 0x5dc   :  { %3922 = vmatprep.subr.bf16.mxu1 %v4196_v0 }
 0x5dd   :  { %vm1483_vm6 = vcmp.eq.s32.totalorder %v1474_v30, %v4810_v27  ;;  %v1079_v30 = vld [vmem:[%s5348_s13] sm:$0x1] }
 0x5de   :  { %vm4830_vm7 = vmpackc.low %vm1483_vm6, %vm1482_vm4 }
 0x5df   :  { %3924 = vmatpush3.bf16.msra.mxu1 %v3923_v33  ;;  %v1476_v33 = vand.u32 7, %v4637_v19  ;;  %v1478_v19 = vand.u32 7, %v4651_v23 }
 0x5e1   :  { %vm1485_vm9 = vcmp.eq.s32.totalorder %v1476_v33, %v4810_v27 }
 0x5e2   :  { %3503 = vmatmul.mubr.msk.f32.vlgmr.msra.gmra.mrb[14].mxu1 %vm536_vm10, %v4695_v24  ;;  %vm4846_vm11 = vmpackc.low %vm1485_vm9, %vm1484_vm8 }
 0x5e3   :  { %3542 = vmatprep.mubr.msk.f32.mxu1 %vm1085_vm13, %v4466_v10 }
 0x6a5   :  { %v1155_v63 = vpop.f32.mrb[12].mxu1 }
 0x6a6   :  { %1233 = vrot.lane.b32.xlu0 %v1155_v63, %s4199_s22  ;;  %v3485_v1 = vpop.f32.mrb[13].mxu1 }
 0x6b5   :  { %v1228_v5 = vpop.f32.mrb[14].mxu1 }
 0x6b6   :  { %v3504_v7 = vpop.f32.mrb[15].mxu1 }
 0x718   :  { %v1234_v12 = vpop.permute.xlu0 %1233 }
 0x719   :  { %v1236_v13 = vsel %vm536_vm10, %v4695_v24, %v1234_v12  ;;  %v4801_v24 = vsel %vm1307_vm15, 1.0, %v4198_v8  ;;  %vm1724_vm15 = vcmp.ne.s32.totalorder %v4810_v27, 0 }
 0x71a   :  { %3538 = vmatmul.mubr.f32.vlgmr.msra.gmra.mrb[8].mxu0 %v1236_v13  ;;  %vm1725_vm1 = vmand %vm453_vm5, %vm1724_vm15 }
 0x71b   :  { %3585 = vmatprep.mubr.msk.f32.mxu0 %vm4197_vm0, %v4198_v8  ;;  %3963 = vmatpush3.bf16.msk.msra.mxu0 %vm4814_vm3, %v4200_v9  ;;  %v1727_v57 = vsel %vm1725_vm1, 1.0, %v4198_v8 }
 0x71c   :  { %3964 = vmatprep.subr.bf16.mxu0 %v4196_v0 }
 0x71f   :  { %3966 = vmatpush3.bf16.msk.msra.mxu0 %vm4830_vm7, %v4200_v9 }
 0x720   :  { %3967 = vmatprep.subr.bf16.mxu0 %v4196_v0 }
 0x723   :  { %3969 = vmatpush3.bf16.msk.msra.mxu0 %vm4846_vm11, %v4200_v9 }
 0x724   :  { %3970 = vmatprep.subr.bf16.mxu0 %v4196_v0 }
 0x7ed   :  { %v1303_v17 = vpop.f32.mrb[8].mxu0 }
 0x7ee   :  { %v3539_v21 = vpop.f32.mrb[9].mxu0  ;;  %3540 = vmatprep.subr.mxu1 %v1303_v17 }
 0x7ef   :  { %3541 = vmatpush3.msra.mxu1 %v1303_v17 }
 0x7f0   :  { %3543 = vmatmul.mubr.msk.f32.vlgmr.msra.gmra.mrb[16].mxu1 %vm1085_vm13, %v4791_v20  ;;  %3545 = vmatprep.subr.mxu1 %v1228_v5 }
 0x7f1   :  { %3546 = vmatpush3.msra.mxu1 %v1228_v5  ;;  %3547 = vmatprep.mubr.msk.f32.mxu1 %vm1085_vm13, %v4463_v6 }
 0x7f2   :  { %3949 = vmatprep.subr.bf16.mxu1 %v4196_v0 }
 0x7f8   :  { %3548 = vmatmul.mubr.msk.f32.vlgmr.msra.gmra.mrb[16].mxu1 %vm1085_vm13, %v4801_v24  ;;  %vm1487_vm13 = vcmp.eq.s32.totalorder %v1478_v19, %v4810_v27  ;;  %v2937_v19 = vld [vmem:[%s5349_s14] ss:$0 sm:$0xff] }
 0x7f9   :  { %3566 = vmatprep.mubr.msk.f32.mxu1 %vm4197_vm0, %v4198_v8  ;;  %3951 = vmatpush3.bf16.msk.msra.mxu1 %vm4814_vm3, %v4200_v9  ;;  %vm4862_vm14 = vmpackc.low %vm1487_vm13, %vm1486_vm12  ;;  %vm1982_vm12 = vcmp.eq.s32.totalorder %v4625_v15, %v4450_v62  ;;  %vm1977_vm13 = vcmp.eq.s32.totalorder %v4622_v14, %v4445_v60 }
 0x7fa   :  { %3952 = vmatprep.subr.bf16.mxu1 %v4196_v0  ;;  %3972 = vmatpush3.bf16.msk.msra.mxu0 %vm4862_vm14, %v4200_v9 }
 0x7fd   :  { %3954 = vmatpush3.bf16.msk.msra.mxu1 %vm4830_vm7, %v4200_v9 }
 0x7fe   :  { %3955 = vmatprep.subr.bf16.mxu1 %v4196_v0 }
 0x801   :  { %3957 = vmatpush3.bf16.msk.msra.mxu1 %vm4846_vm11, %v4200_v9 }
 0x802   :  { %3958 = vmatprep.subr.bf16.mxu1 %v4196_v0 }
 0x805   :  { %3960 = vmatpush3.bf16.msk.msra.mxu1 %vm4862_vm14, %v4200_v9 }
 0x8cb   :  { %v3549_v22 = vpop.f32.mrb[16].mxu1 }
 0x8cc   :  { %v1497_v23 = vsel %vm536_vm10, %v3549_v22, 0.0  ;;  %v1506_v36 = vmul.f32 %v3549_v22, %v3549_v22  ;;  %v1462_v37 = vpop.f32.mrb[17].mxu1 }
 0x8cd   :  { %v1496_v38 = vsel %vm536_vm10, %v1462_v37, 0.0  ;;  %v1505_v39 = vmul.f32 %v1462_v37, %v1462_v37 }
 0x8ce   :  { %v1508_v40 = vsel %vm536_vm10, %v1506_v36, 0.0  ;;  %v1498_v41 = vadd.f32 %v1497_v23, %v1496_v38  ;;  %v4895_v23 = vadd.s32 1, %v4588_v2 }
 0x8cf   :  { %v1507_v42 = vsel %vm536_vm10, %v1505_v39, 0.0  ;;  %v1696_v39 = vld [vmem:[%s5350_s15] sm:$0xff] }
 0x8d0   :  { %v1499_v44 = vrot.slane %v1498_v41, 4  ;;  %v1509_v45 = vadd.f32 %v1508_v40, %v1507_v42  ;;  %vm1723_vm4 = vcmp.eq.s32.totalorder %v4442_v59, %v4895_v23  ;;  %v1697_v40 = vld [vmem:[%s5350_s15 + $0x8] sm:$0xff] }
 0x8d1   :  { %vm1726_vm9 = vmand %vm1723_vm4, %vm1724_vm15  ;;  %vm1978_vm15 = vcmp.eq.s32.totalorder %v4625_v15, %v4445_v60  ;;  %v2175_v60 = vadd.s32 64, %v4447_v61 }
 0x8d2   :  { %v1500_v46 = vadd.f32 %v1499_v44, %v1498_v41  ;;  %v1510_v47 = vrot.slane %v1509_v45, 4 }
 0x8d4   :  { %v1501_v48 = vrot.slane %v1500_v46, 2  ;;  %v1511_v49 = vadd.f32 %v1510_v47, %v1509_v45  ;;  %v3977_v47 = vpack.c.bf16 %v1697_v40, %v1696_v39  ;;  %v1719_v39 = vld [vmem:[%s5351_s16 + $0x78] sm:$0xff] }
 0x8d6   :  { %v1502_v50 = vadd.f32 %v1501_v48, %v1500_v46  ;;  %v1512_v51 = vrot.slane %v1511_v49, 2  ;;  %v1698_v48 = vld [vmem:[%s5350_s15 + $0x10] sm:$0xff] }
 0x8d8   :  { %v1503_v52 = vrot.slane %v1502_v50, 1  ;;  %v1513_v53 = vadd.f32 %v1512_v51, %v1511_v49  ;;  %v1699_v49 = vld [vmem:[%s5350_s15 + $0x18] sm:$0xff] }
 0x8d9   :  { %v3981_v51 = vpack.c.bf16 %v1699_v49, %v1698_v48 }
 0x8da   :  { %v1504_v54 = vadd.f32 %v1503_v52, %v1502_v50  ;;  %v1514_v55 = vrot.slane %v1513_v53, 1  ;;  %v1728_v50 = vsel %vm1726_vm9, 1.0, %v4198_v8  ;;  %v1700_v52 = vld [vmem:[%s5350_s15 + $0x20] sm:$0xff] }
 0x8dc   :  { %3567 = vmatmul.mubr.msk.f32.vlgmr.msra.gmra.mrb[18].mxu1 %vm536_vm10, %v1504_v54  ;;  %v1515_v56 = vadd.f32 %v1514_v55, %v1513_v53  ;;  %v1701_v53 = vld [vmem:[%s5350_s15 + $0x28] sm:$0xff]  ;;  %v1702_v55 = vld [vmem:[%s5350_s15 + $0x30] sm:$0xff] }
 0x8dd   :  { %3592 = vmatprep.mubr.msk.f32.mxu1 %vm1729_vm2, %v1727_v57  ;;  %v3985_v54 = vpack.c.bf16 %v1701_v53, %v1700_v52 }
 0x8de   :  { %3586 = vmatmul.mubr.msk.f32.vlgmr.msra.gmra.mrb[10].mxu0 %vm536_vm10, %v1515_v56  ;;  %v1703_v56 = vld [vmem:[%s5350_s15 + $0x38] sm:$0xff] }
 0x8df   :  { %v3989_v57 = vpack.c.bf16 %v1703_v56, %v1702_v55 }
 0x9af   :  { %v1585_v58 = vpop.f32.mrb[18].mxu1 }
 0x9b0   :  { %v1590_v63 = vmul.f32 0.0078125, %v1585_v58  ;;  %v3568_v1 = vpop.f32.mrb[19].mxu1  ;;  %v1704_v58 = vld [vmem:[%s5351_s16] sm:$0xff] }
 0x9b1   :  { %v1660_v5 = vpop.f32.mrb[10].mxu0  ;;  %v1706_v1 = vld [vmem:[%s5351_s16 + $0x10] sm:$0xff] }
 0x9b2   :  { %v1665_v7 = vmul.f32 %v1590_v63, %v1590_v63  ;;  %v1670_v12 = vrot.slane %v1590_v63, %v4674_v43  ;;  %v1664_v13 = vmul.f32 0.0078125, %v1660_v5  ;;  %v3587_v17 = vpop.f32.mrb[11].mxu0  ;;  %v1705_v63 = vld [vmem:[%s5351_s16 + $0x8] sm:$0xff] }
 0x9b3   :  { %v3993_v5 = vpack.c.bf16 %v1705_v63, %v1704_v58  ;;  %v2186_v58 = vand.u32 7, %v2178_v34  ;;  %v2179_v63 = vadd.s32 96, %v4447_v61  ;;  %v2419_v34 = vld [vmem:[%s5352_s19 + $0x20] sm:$0xff] }
 0x9b4   :  { %v1671_v21 = vsub.f32 %v1462_v37, %v1670_v12  ;;  %v1672_v25 = vsub.f32 %v3549_v22, %v1670_v12  ;;  %v1666_v26 = vsub.f32 %v1664_v13, %v1665_v7  ;;  %v1707_v7 = vld [vmem:[%s5351_s16 + $0x18] sm:$0xff]  ;;  %v1709_v13 = vld [vmem:[%s5351_s16 + $0x28] sm:$0xff] }
 0x9b5   :  { %v3997_v12 = vpack.c.bf16 %v1707_v7, %v1706_v1  ;;  %3994 = vmatprep.subr.bf16.mxu0 %v3993_v5  ;;  %v2180_v1 = vadd.s32 104, %v4447_v61 }
 0x9b6   :  { %v1673_v29 = vadd.f32 1e-05, %v1666_v26  ;;  %3996 = vmatpush3.bf16.msra.mxu0 %v3993_v5  ;;  %v2187_v5 = vand.u32 7, %v2179_v63  ;;  %v2438_v63 = vld [vmem:[%s5352_s19 + $0xb8] sm:$0xff] }
 0x9b7   :  { %3998 = vmatprep.subr.bf16.mxu0 %v3997_v12  ;;  %v2188_v7 = vand.u32 7, %v2180_v1 }
 0x9b8   :  { %4184 = vrsqrt.f32 %v1673_v29  ;;  %v1712_v29 = vld [vmem:[%s5351_s16 + $0x40] sm:$0xff] }
 0x9ba   :  { %4000 = vmatpush3.bf16.msra.mxu0 %v3997_v12  ;;  %v2181_v12 = vadd.s32 112, %v4447_v61 }
 0x9c2   :  { %v4185_v32 = vpop.eup %4184 }
 0x9c3   :  { %v1675_v33 = vmul.f32 %v4185_v32, %v1079_v30  ;;  %v1713_v30 = vld [vmem:[%s5351_s16 + $0x48] sm:$0xff] }
 0x9c4   :  { %v4009_v32 = vpack.c.bf16 %v1713_v30, %v1712_v29 }
 0x9c5   :  { %v1679_v18 = vrot.slane %v1675_v33, %v4674_v43  ;;  %v1714_v33 = vld [vmem:[%s5351_s16 + $0x50] sm:$0xff] }
 0x9c7   :  { %v1680_v36 = vmul.f32 %v1679_v18, %v1671_v21  ;;  %v1681_v22 = vmul.f32 %v1679_v18, %v1672_v25  ;;  %v1710_v21 = vld [vmem:[%s5351_s16 + $0x30] sm:$0xff]  ;;  %v1711_v25 = vld [vmem:[%s5351_s16 + $0x38] sm:$0xff] }
 0x9c8   :  { %v4005_v26 = vpack.c.bf16 %v1711_v25, %v1710_v21  ;;  %v1715_v18 = vld [vmem:[%s5351_s16 + $0x58] sm:$0xff] }
 0x9c9   :  { %v1688_v37 = vadd.f32 %v2937_v19, %v1680_v36  ;;  %v1689_v38 = vadd.f32 %v2937_v19, %v1681_v22  ;;  %v4013_v19 = vpack.c.bf16 %v1715_v18, %v1714_v33  ;;  %v1716_v36 = vld [vmem:[%s5351_s16 + $0x60] sm:$0xff]  ;;  %v1717_v22 = vld [vmem:[%s5351_s16 + $0x68] sm:$0xff] }
 0x9cb   :  { %vm1690_vm6 = vcmp.ge.f32.partialorder %v1688_v37, 0.0  ;;  %vm1691_vm8 = vcmp.ge.f32.partialorder %v1689_v38, 0.0  ;;  %v1692_v41 = vmul.f32 0.01, %v1688_v37  ;;  %v1693_v42 = vmul.f32 0.01, %v1689_v38 }
 0x9cd   :  { %v4905_v44 = vsel %vm1690_vm6, %v1688_v37, %v1692_v41  ;;  %v4907_v45 = vsel %vm1691_vm8, %v1689_v38, %v1693_v42  ;;  %v4017_v37 = vpack.c.bf16 %v1717_v22, %v1716_v36  ;;  %v1718_v38 = vld [vmem:[%s5351_s16 + $0x70] sm:$0xff]  ;;  %vm2196_vm6 = vcmp.eq.s32.totalorder %v2188_v7, %v4810_v27 }
 0x9ce   :  { %v3973_v46 = vpack.c.bf16 %v4907_v45, %v4905_v44  ;;  %v4021_v40 = vpack.c.bf16 %v1719_v39, %v1718_v38  ;;  %v2421_v7 = vld [vmem:[%s5352_s19 + $0x30] sm:$0xff] }
 0x9d0   :  { %3974 = vmatprep.subr.bf16.mxu1 %v3973_v46 }
 0x9d1   :  { %3976 = vmatpush3.bf16.msra.mxu1 %v3973_v46 }
 0x9d2   :  { %3978 = vmatprep.subr.bf16.mxu1 %v3977_v47 }
 0x9d4   :  { %3593 = vmatmul.mubr.msk.f32.vlgmr.msra.gmra.mrb[20].mxu1 %vm1729_vm2, %v1728_v50 }
 0x9d5   :  { %3980 = vmatpush3.bf16.msra.mxu1 %v3977_v47  ;;  %3611 = vmatprep.mubr.msk.f32.mxu1 %vm536_vm10, %v4905_v44 }
 0x9d6   :  { %3982 = vmatprep.subr.bf16.mxu1 %v3981_v51 }
 0x9d9   :  { %3984 = vmatpush3.bf16.msra.mxu1 %v3981_v51 }
 0x9da   :  { %3986 = vmatprep.subr.bf16.mxu1 %v3985_v54 }
 0x9dd   :  { %3988 = vmatpush3.bf16.msra.mxu1 %v3985_v54 }
 0x9de   :  { %3990 = vmatprep.subr.bf16.mxu1 %v3989_v57 }
 0x9e1   :  { %3992 = vmatpush3.bf16.msra.mxu1 %v3989_v57  ;;  %v1984_v57 = vsel %vm1982_vm12, 1.0, %v4198_v8 }
 0x9e4   :  { %3612 = vmatmul.mubr.msk.f32.vlgmr.msra.gmra.mrb[22].mxu1 %vm536_vm10, %v4907_v45 }
 0x9e5   :  { %3653 = vmatprep.mubr.msk.f32.mxu1 %vm1729_vm2, %v4466_v10  ;;  %v1708_v10 = vld [vmem:[%s5351_s16 + $0x20] sm:$0xff] }
 0x9e6   :  { %v4001_v17 = vpack.c.bf16 %v1709_v13, %v1708_v10  ;;  %v2182_v10 = vadd.s32 120, %v4447_v61  ;;  %v2189_v13 = vand.u32 7, %v2181_v12  ;;  %v2422_v12 = vld [vmem:[%s5352_s19 + $0x38] sm:$0xff] }
 0x9e8   :  { %4002 = vmatprep.subr.bf16.mxu0 %v4001_v17  ;;  %vm2197_vm9 = vcmp.eq.s32.totalorder %v2189_v13, %v4810_v27  ;;  %v2440_v13 = vld [vmem:[%s5352_s19 + $0xc8] sm:$0xff] }
 0x9e9   :  { %4004 = vmatpush3.bf16.msra.mxu0 %v4001_v17  ;;  %v2190_v17 = vand.u32 7, %v2182_v10  ;;  %v2439_v10 = vld [vmem:[%s5352_s19 + $0xc0] sm:$0xff] }
 0x9ea   :  { %4006 = vmatprep.subr.bf16.mxu0 %v4005_v26 }
 0x9ed   :  { %4008 = vmatpush3.bf16.msra.mxu0 %v4005_v26 }
 0x9ee   :  { %4010 = vmatprep.subr.bf16.mxu0 %v4009_v32 }
 0x9f1   :  { %4012 = vmatpush3.bf16.msra.mxu0 %v4009_v32 }
 0x9f2   :  { %4014 = vmatprep.subr.bf16.mxu0 %v4013_v19 }
 0x9f5   :  { %4016 = vmatpush3.bf16.msra.mxu0 %v4013_v19 }
 0x9f6   :  { %4018 = vmatprep.subr.bf16.mxu0 %v4017_v37 }
 0x9f9   :  { %4020 = vmatpush3.bf16.msra.mxu0 %v4017_v37 }
 0x9fa   :  { %4022 = vmatprep.subr.bf16.mxu0 %v4021_v40 }
 0x9fd   :  { %4024 = vmatpush3.bf16.msra.mxu0 %v4021_v40 }
 0x9fe   :  { %4057 = vmatprep.subr.bf16.mxu0 %v4196_v0 }
 0xaa7   :  { %v3594_v41 = vpop.f32.mrb[20].mxu1 }
 0xaa8   :  { %v1802_v42 = vpop.f32.mrb[21].mxu1 }
 0xaa9   :  { %v4175_v46 = vpack.i.bf16 %v3594_v41, %v1802_v42 }
 0xaab   :  { %4176 = vrot.lane.b32.xlu1 %v4175_v46, %s4199_s22 }
 0xab7   :  { %v3613_v47 = vpop.f32.mrb[22].mxu1 }
 0xab8   :  { %v1883_v48 = vpop.f32.mrb[23].mxu1 }
 0xab9   :  { %v4029_v49 = vpack.c.bf16 %v3613_v47, %v1883_v48 }
 0xb1d   :  { %v4177_v50 = vpop.permute.xlu1 %4176 }
 0xb1e   :  { %v4179_v51 = vunpack.i.h.bf16 %v4177_v50  ;;  %v4178_v52 = vunpack.i.l.bf16 %v4177_v50 }
 0xb20   :  { %v1900_v53 = vsel %vm536_vm10, %v4905_v44, %v4178_v52  ;;  %v1901_v54 = vsel %vm536_vm10, %v4907_v45, %v4179_v51  ;;  %vm1981_vm10 = vcmp.eq.s32.totalorder %v4622_v14, %v4450_v62  ;;  %v1979_v62 = vsel %vm1977_vm13, 1.0, %v4198_v8 }
 0xb21   :  { %3646 = vmatprep.mubr.f32.mxu0 %v1900_v53  ;;  %v1983_v56 = vsel %vm1981_vm10, 1.0, %v4198_v8  ;;  %vm2198_vm10 = vcmp.eq.s32.totalorder %v2190_v17, %v4810_v27  ;;  %v2983_v52 = vadd.s32 4294967295, %v4447_v61  ;;  %v4111_v17 = vpack.c.bf16 %v2422_v12, %v2421_v7 }
 0xb22   :  { %3647 = vmatmul.mubr.f32.vlgmr.msra.gmra.mrb[12].mxu0 %v1901_v54  ;;  %vm4055_vm12 = vmpackc.low %vm2198_vm10, %vm2197_vm9  ;;  %v2431_v54 = vld [vmem:[%s5352_s19 + $0x80] sm:$0xff]  ;;  %v2985_v7 = vadd.s32 4294967295, %v4622_v14  ;;  %vm2586_vm10 = vcmp.ne.s32.totalorder %v4592_v4, 0 }
 0xb23   :  { %4059 = vmatpush3.bf16.msk.msra.mxu0 %vm4814_vm3, %v4200_v9  ;;  %3736 = vmatprep.mubr.msk.f32.mxu0 %vm4197_vm0, %v4198_v8  ;;  %vm2468_vm13 = vcmp.eq.s32.totalorder %v4442_v59, %v2983_v52 }
 0xb24   :  { %4060 = vmatprep.subr.bf16.mxu0 %v4196_v0 }
 0xb27   :  { %4062 = vmatpush3.bf16.msk.msra.mxu0 %vm4830_vm7, %v4200_v9 }
 0xb28   :  { %4063 = vmatprep.subr.bf16.mxu0 %v4196_v0 }
 0xb2b   :  { %4065 = vmatpush3.bf16.msk.msra.mxu0 %vm4846_vm11, %v4200_v9 }
 0xb2c   :  { %4066 = vmatprep.subr.bf16.mxu0 %v4196_v0 }
 0xb2f   :  { %4068 = vmatpush3.bf16.msk.msra.mxu0 %vm4862_vm14, %v4200_v9 }
 0xb30   :  { %4069 = vmatprep.subr.bf16.mxu0 %v4196_v0 }
 0xbf5   :  { %v3648_v44 = vpop.f32.mrb[12].mxu0 }
 0xbf6   :  { %v1968_v45 = vpop.f32.mrb[13].mxu0 }
 0xbf7   :  { %v4025_v55 = vpack.c.bf16 %v3648_v44, %v1968_v45  ;;  %v2432_v44 = vld [vmem:[%s5352_s19 + $0x88] sm:$0xff]  ;;  %v2415_v45 = vld [vmem:[%s5352_s19] sm:$0xff] }
 0xbf9   :  { %4026 = vmatprep.subr.bf16.mxu1 %v4025_v55 }
 0xbfa   :  { %4028 = vmatpush3.bf16.msra.mxu1 %v4025_v55  ;;  %v2433_v55 = vld [vmem:[%s5352_s19 + $0x90] sm:$0xff] }
 0xbfb   :  { %4030 = vmatprep.subr.bf16.mxu1 %v4029_v49 }
 0xbfd   :  { %3654 = vmatmul.mubr.msk.f32.vlgmr.msra.gmra.mrb[24].mxu1 %vm1729_vm2, %v4791_v20  ;;  %v1980_v20 = vsel %vm1978_vm15, 1.0, %v4198_v8  ;;  %vm2472_vm15 = vcmp.ne.s32.totalorder %v841_v3, 0  ;;  %v2416_v3 = vld [vmem:[%s5352_s19 + $0x8] sm:$0xff] }
 0xbfe   :  { %4032 = vmatpush3.bf16.msra.mxu1 %v4029_v49  ;;  %3656 = vmatprep.mubr.msk.f32.mxu1 %vm1729_vm2, %v1983_v56  ;;  %v2434_v56 = vld [vmem:[%s5352_s19 + $0x98] sm:$0xff] }
 0xbff   :  { %4033 = vmatprep.subr.bf16.mxu1 %v4196_v0 }
 0xc01   :  { %3657 = vmatmul.mubr.msk.f32.gmra.mrb[26].mxu1 %vm1729_vm2, %v1984_v57  ;;  %v4099_v57 = vpack.c.bf16 %v2416_v3, %v2415_v45 }
 0xc02   :  { %3663 = vmatprep.mubr.msk.f32.mxu1 %vm1729_vm2, %v4463_v6  ;;  %v2176_v6 = vadd.s32 72, %v4447_v61  ;;  %v4097_v61 = vpack.c.bf16 %v2432_v44, %v2431_v54 }
 0xc04   :  { %v2184_v28 = vand.u32 7, %v2176_v6  ;;  %v2435_v6 = vld [vmem:[%s5352_s19 + $0xa0] sm:$0xff] }
 0xc05   :  { %3664 = vmatmul.mubr.msk.f32.vlgmr.msra.gmra.mrb[24].mxu1 %vm1729_vm2, %v4801_v24  ;;  %v2183_v24 = vand.u32 7, %v2175_v60  ;;  %v2418_v60 = vld [vmem:[%s5352_s19 + $0x18] sm:$0xff] }
 0xc06   :  { %3666 = vmatprep.mubr.msk.f32.mxu1 %vm1729_vm2, %v1979_v62  ;;  %4035 = vmatpush3.bf16.msk.msra.mxu1 %vm4814_vm3, %v4200_v9  ;;  %vm2192_vm3 = vcmp.eq.s32.totalorder %v2184_v28, %v4810_v27  ;;  %v4101_v62 = vpack.c.bf16 %v2434_v56, %v2433_v55 }
 0xc07   :  { %4036 = vmatprep.subr.bf16.mxu1 %v4196_v0 }
 0xc09   :  { %3667 = vmatmul.mubr.msk.f32.gmra.mrb[26].mxu1 %vm1729_vm2, %v1980_v20  ;;  %vm2195_vm2 = vcmp.eq.s32.totalorder %v2187_v5, %v4810_v27  ;;  %v2417_v20 = vld [vmem:[%s5352_s19 + $0x10] sm:$0xff] }
 0xc0a   :  { %4038 = vmatpush3.bf16.msk.msra.mxu1 %vm4830_vm7, %v4200_v9  ;;  %3701 = vmatprep.mubr.msk.f32.mxu1 %vm4197_vm0, %v4198_v8  ;;  %vm2191_vm0 = vcmp.eq.s32.totalorder %v2183_v24, %v4810_v27  ;;  %vm4052_vm8 = vmpackc.low %vm2196_vm6, %vm2195_vm2  ;;  %v2436_v24 = vld [vmem:[%s5352_s19 + $0xa8] sm:$0xff]  ;;  %v4103_v28 = vpack.c.bf16 %v2418_v60, %v2417_v20  ;;  %vm2470_vm2 = vcmp.eq.s32.totalorder %v4442_v59, %v2985_v7  ;;  %vm2474_vm6 = vcmp.ne.s32.totalorder %v843_v16, 0 }
 0xc0b   :  { %4039 = vmatprep.subr.bf16.mxu1 %v4196_v0  ;;  %vm4046_vm7 = vmpackc.low %vm2192_vm3, %vm2191_vm0  ;;  %vm2484_vm3 = vcmask 261120   ;;  %v4105_v31 = vpack.c.bf16 %v2436_v24, %v2435_v6  ;;  %v1720_v24 = vld [vmem:[%s5353_s17] sm:$0x1]  ;;  %v2583_v16 = vadd.s32 1, %v4625_v15 }
 0xc0c   :  { %4071 = vmatpush3.bf16.msk.msra.mxu0 %vm4046_vm7, %v4200_v9  ;;  %vm2476_vm0 = vmand %vm2468_vm13, %vm2472_vm15 }
 0xc0d   :  { %4072 = vmatprep.subr.bf16.mxu0 %v4196_v0  ;;  %v2480_v53 = vsel %vm2476_vm0, 1.0, %v4198_v8  ;;  %vm2478_vm9 = vmand %vm2470_vm2, %vm2474_vm6 }
 0xc0e   :  { %4041 = vmatpush3.bf16.msk.msra.mxu1 %vm4846_vm11, %v4200_v9  ;;  %vm2193_vm11 = vcmp.eq.s32.totalorder %v2185_v35, %v4810_v27  ;;  %v2420_v35 = vld [vmem:[%s5352_s19 + $0x28] sm:$0xff]  ;;  %vm2587_vm13 = vmand %vm453_vm5, %vm2586_vm10 }
 0xc0f   :  { %4042 = vmatprep.subr.bf16.mxu1 %v4196_v0  ;;  %v4107_v1 = vpack.c.bf16 %v2420_v35, %v2419_v34  ;;  %vm2588_vm5 = vmand %vm1723_vm4, %vm2586_vm10 }
 0xc10   :  { %v2592_v23 = vsel %vm2588_vm5, 1.0, %v4198_v8 }
 0xc12   :  { %4044 = vmatpush3.bf16.msk.msra.mxu1 %vm4862_vm14, %v4200_v9  ;;  %vm2194_vm14 = vcmp.eq.s32.totalorder %v2186_v58, %v4810_v27  ;;  %v2437_v58 = vld [vmem:[%s5352_s19 + $0xb0] sm:$0xff] }
 0xc13   :  { %4045 = vmatprep.subr.bf16.mxu1 %v4196_v0  ;;  %vm4049_vm1 = vmpackc.low %vm2194_vm14, %vm2193_vm11  ;;  %v4109_v5 = vpack.c.bf16 %v2438_v63, %v2437_v58 }
 0xc14   :  { %4074 = vmatpush3.bf16.msk.msra.mxu0 %vm4049_vm1, %v4200_v9 }
 0xc15   :  { %4075 = vmatprep.subr.bf16.mxu0 %v4196_v0 }
 0xc16   :  { %4047 = vmatpush3.bf16.msk.msra.mxu1 %vm4046_vm7, %v4200_v9 }
 0xc17   :  { %4048 = vmatprep.subr.bf16.mxu1 %v4196_v0 }
 0xc18   :  { %4077 = vmatpush3.bf16.msk.msra.mxu0 %vm4052_vm8, %v4200_v9 }
 0xc19   :  { %4078 = vmatprep.subr.bf16.mxu0 %v4196_v0 }
 0xc1a   :  { %4050 = vmatpush3.bf16.msk.msra.mxu1 %vm4049_vm1, %v4200_v9 }
 0xc1b   :  { %4051 = vmatprep.subr.bf16.mxu1 %v4196_v0 }
 0xc1c   :  { %4080 = vmatpush3.bf16.msk.msra.mxu0 %vm4055_vm12, %v4200_v9 }
 0xc1d   :  { %4098 = vmatprep.subr.bf16.mxu0 %v4097_v61 }
 0xc1e   :  { %4053 = vmatpush3.bf16.msk.msra.mxu1 %vm4052_vm8, %v4200_v9 }
 0xc1f   :  { %4054 = vmatprep.subr.bf16.mxu1 %v4196_v0 }
 0xc22   :  { %4056 = vmatpush3.bf16.msk.msra.mxu1 %vm4055_vm12, %v4200_v9 }
 0xcd8   :  { %v5085_v21 = vpop.f32.mrb[24].mxu1 }
 0xcd9   :  { %v2217_v25 = vmul.f32 %v5085_v21, %v5085_v21  ;;  %v5089_v26 = vpop.f32.mrb[25].mxu1 }
 0xcda   :  { %v2207_v29 = vadd.f32 %v5085_v21, %v5089_v26  ;;  %v2216_v0 = vmul.f32 %v5089_v26, %v5089_v26 }
 0xcdc   :  { %v2220_v30 = vadd.f32 %v2217_v25, %v2216_v0  ;;  %v5095_v27 = vpop.f32.mrb[26].mxu1  ;;  %v4113_v25 = vpack.c.bf16 %v2440_v13, %v2439_v10  ;;  %v2424_v0 = vld [vmem:[%s5352_s19 + $0x48] sm:$0xff] }
 0xcdd   :  { %v5097_v32 = vpop.f32.mrb[27].mxu1  ;;  %v2219_v18 = vmul.f32 %v5095_v27, %v5095_v27 }
 0xcde   :  { %v2208_v9 = vadd.f32 %v2207_v29, %v5097_v32  ;;  %v2218_v33 = vmul.f32 %v5097_v32, %v5097_v32  ;;  %v2423_v29 = vld [vmem:[%s5352_s19 + $0x40] sm:$0xff] }
 0xce0   :  { %v2209_v19 = vadd.f32 %v5095_v27, %v2208_v9  ;;  %v2221_v36 = vadd.f32 %v2220_v30, %v2218_v33  ;;  %v2441_v30 = vld [vmem:[%s5352_s19 + $0xd0] sm:$0xff]  ;;  %v2442_v9 = vld [vmem:[%s5352_s19 + $0xd8] sm:$0xff]  ;;  %v4115_v33 = vpack.c.bf16 %v2424_v0, %v2423_v29 }
 0xce2   :  { %v2210_v22 = vrot.slane %v2209_v19, 4  ;;  %v2222_v37 = vadd.f32 %v2221_v36, %v2219_v18  ;;  %v4117_v18 = vpack.c.bf16 %v2442_v9, %v2441_v30  ;;  %v2426_v36 = vld [vmem:[%s5352_s19 + $0x58] sm:$0xff]  ;;  %v2984_v9 = vadd.s32 4294967295, %v4588_v2 }
 0xce3   :  { %v2582_v2 = vadd.s32 1, %v4622_v14  ;;  %v2447_v14 = vld [vmem:[%s5352_s19 + $0x100] sm:$0xff] }
 0xce4   :  { %v2211_v38 = vadd.f32 %v2210_v22, %v2209_v19  ;;  %v2223_v39 = vrot.slane %v2222_v37, 4  ;;  %v2425_v19 = vld [vmem:[%s5352_s19 + $0x50] sm:$0xff]  ;;  %v2443_v22 = vld [vmem:[%s5352_s19 + $0xe0] sm:$0xff]  ;;  %vm2469_vm8 = vcmp.eq.s32.totalorder %v4442_v59, %v2984_v9 }
 0xce5   :  { %vm2584_vm15 = vcmp.eq.s32.totalorder %v4442_v59, %v2582_v2 }
 0xce6   :  { %v2212_v40 = vrot.slane %v2211_v38, 2  ;;  %v2224_v41 = vadd.f32 %v2223_v39, %v2222_v37  ;;  %v2444_v37 = vld [vmem:[%s5352_s19 + $0xe8] sm:$0xff]  ;;  %vm2589_vm0 = vmand %vm2584_vm15, %vm2586_vm10 }
 0xce7   :  { %v4121_v39 = vpack.c.bf16 %v2444_v37, %v2443_v22  ;;  %v2448_v22 = vld [vmem:[%s5352_s19 + $0x108] sm:$0xff] }
 0xce8   :  { %v2213_v42 = vadd.f32 %v2212_v40, %v2211_v38  ;;  %v2225_v46 = vrot.slane %v2224_v41, 2  ;;  %v4119_v38 = vpack.c.bf16 %v2426_v36, %v2425_v19  ;;  %v2427_v40 = vld [vmem:[%s5352_s19 + $0x60] sm:$0xff]  ;;  %v2481_v19 = vsel %vm2469_vm8, 1.0, %v4198_v8 }
 0xce9   :  { %v2482_v36 = vsel %vm2478_vm9, 1.0, %v4198_v8  ;;  %v4129_v37 = vpack.c.bf16 %v2448_v22, %v2447_v14 }
 0xcea   :  { %v2214_v47 = vrot.slane %v2213_v42, 1  ;;  %v2226_v48 = vadd.f32 %v2225_v46, %v2224_v41  ;;  %v2428_v41 = vld [vmem:[%s5352_s19 + $0x68] sm:$0xff]  ;;  %v2446_v46 = vld [vmem:[%s5352_s19 + $0xf8] sm:$0xff] }
 0xcec   :  { %v2215_v49 = vadd.f32 %v2214_v47, %v2213_v42  ;;  %v2227_v50 = vrot.slane %v2226_v48, 1  ;;  %v2445_v42 = vld [vmem:[%s5352_s19 + $0xf0] sm:$0xff]  ;;  %v4123_v47 = vpack.c.bf16 %v2428_v41, %v2427_v40  ;;  %v2593_v40 = vsel %vm2589_vm0, 1.0, %v4198_v8  ;;  %v2451_v41 = vld [vmem:[%s5352_s19 + $0x120] sm:$0xff] }
 0xcee   :  { %3702 = vmatmul.mubr.f32.vlgmr.msra.gmra.mrb[28].mxu1 %v2215_v49  ;;  %v2228_v51 = vadd.f32 %v2227_v50, %v2226_v48  ;;  %v4125_v48 = vpack.c.bf16 %v2446_v46, %v2445_v42  ;;  %v2429_v49 = vld [vmem:[%s5352_s19 + $0x70] sm:$0xff]  ;;  %v2430_v50 = vld [vmem:[%s5352_s19 + $0x78] sm:$0xff]  ;;  %v2452_v42 = vld [vmem:[%s5352_s19 + $0x128] sm:$0xff] }
 0xcef   :  { %3747 = vmatprep.mubr.msk.f32.mxu1 %vm2484_vm3, %v2480_v53  ;;  %v4137_v4 = vpack.c.bf16 %v2452_v42, %v2451_v41 }
 0xcf0   :  { %3737 = vmatmul.mubr.f32.vlgmr.msra.gmra.mrb[14].mxu0 %v2228_v51  ;;  %v4127_v51 = vpack.c.bf16 %v2430_v50, %v2429_v49  ;;  %v2456_v50 = vld [vmem:[%s5352_s19 + $0x148] sm:$0xff] }
 0xcf1   :  { %4100 = vmatpush3.bf16.msra.mxu0 %v4099_v57 }
 0xcf2   :  { %4102 = vmatprep.subr.bf16.mxu0 %v4101_v62 }
 0xcf5   :  { %4104 = vmatpush3.bf16.msra.mxu0 %v4103_v28 }
 0xcf6   :  { %4106 = vmatprep.subr.bf16.mxu0 %v4105_v31 }
 0xcf9   :  { %4108 = vmatpush3.bf16.msra.mxu0 %v4107_v1 }
 0xcfa   :  { %4110 = vmatprep.subr.bf16.mxu0 %v4109_v5 }
 0xcfd   :  { %4112 = vmatpush3.bf16.msra.mxu0 %v4111_v17 }
 0xcfe   :  { %4114 = vmatprep.subr.bf16.mxu0 %v4113_v25 }
 0xd01   :  { %4116 = vmatpush3.bf16.msra.mxu0 %v4115_v33 }
 0xd02   :  { %4118 = vmatprep.subr.bf16.mxu0 %v4117_v18  ;;  %v2986_v18 = vadd.s32 4294967295, %v4625_v15  ;;  %v2591_v15 = vsel %vm2587_vm13, 1.0, %v4198_v8 }
 0xd04   :  { %vm2471_vm12 = vcmp.eq.s32.totalorder %v4442_v59, %v2986_v18 }
 0xd05   :  { %4120 = vmatpush3.bf16.msra.mxu0 %v4119_v38  ;;  %v2483_v11 = vsel %vm2471_vm12, 1.0, %v4198_v8  ;;  %v2449_v38 = vld [vmem:[%s5352_s19 + $0x110] sm:$0xff] }
 0xd06   :  { %4122 = vmatprep.subr.bf16.mxu0 %v4121_v39  ;;  %v2450_v39 = vld [vmem:[%s5352_s19 + $0x118] sm:$0xff] }
 0xd09   :  { %4124 = vmatpush3.bf16.msra.mxu0 %v4123_v47  ;;  %v2453_v47 = vld [vmem:[%s5352_s19 + $0x130] sm:$0xff] }
 0xd0a   :  { %4126 = vmatprep.subr.bf16.mxu0 %v4125_v48  ;;  %v2454_v48 = vld [vmem:[%s5352_s19 + $0x138] sm:$0xff] }
 0xd0b   :  { %v4141_v49 = vpack.c.bf16 %v2454_v48, %v2453_v47 }
 0xd0d   :  { %4128 = vmatpush3.bf16.msra.mxu0 %v4127_v51 }
 0xdc1   :  { %v2295_v52 = vpop.f32.mrb[28].mxu1 }
 0xdc2   :  { %v2300_v53 = vmul.f32 0.001953125, %v2295_v52  ;;  %v3703_v54 = vpop.f32.mrb[29].mxu1  ;;  %v2457_v52 = vld [vmem:[%s5352_s19 + $0x150] sm:$0xff] }
 0xdc3   :  { %v2367_v44 = vpop.f32.mrb[14].mxu0 }
 0xdc4   :  { %v2372_v45 = vmul.f32 %v2300_v53, %v2300_v53  ;;  %v2377_v61 = vrot.slane %v2300_v53, %v4674_v43  ;;  %v2371_v3 = vmul.f32 0.001953125, %v2367_v44  ;;  %v3738_v55 = vpop.f32.mrb[15].mxu0  ;;  %v2458_v53 = vld [vmem:[%s5352_s19 + $0x158] sm:$0xff]  ;;  %v2459_v44 = vld [vmem:[%s5352_s19 + $0x160] sm:$0xff] }
 0xdc5   :  { %v4149_v54 = vpack.c.bf16 %v2458_v53, %v2457_v52  ;;  %v2462_v55 = vld [vmem:[%s5352_s19 + $0x178] sm:$0xff] }
 0xdc6   :  { %v2379_v56 = vsub.f32 %v5085_v21, %v2377_v61  ;;  %v2380_v57 = vsub.f32 %v5097_v32, %v2377_v61  ;;  %v2381_v62 = vsub.f32 %v5095_v27, %v2377_v61  ;;  %v2373_v20 = vsub.f32 %v2371_v3, %v2372_v45  ;;  %v2982_v21 = vld [vmem:[%s5354_s18] ss:$0 sm:$0xff]  ;;  %v2460_v45 = vld [vmem:[%s5352_s19 + $0x168] sm:$0xff]  ;;  %v2461_v3 = vld [vmem:[%s5352_s19 + $0x170] sm:$0xff] }
 0xdc7   :  { %v2378_v60 = vsub.f32 %v5089_v26, %v2377_v61  ;;  %v4153_v61 = vpack.c.bf16 %v2460_v45, %v2459_v44 }
 0xdc8   :  { %v2382_v6 = vadd.f32 1e-05, %v2373_v20 }
 0xdca   :  { %4186 = vrsqrt.f32 %v2382_v6 }
 0xdd4   :  { %v4187_v28 = vpop.eup %4186 }
 0xdd5   :  { %v2384_v31 = vmul.f32 %v4187_v28, %v1720_v24 }
 0xdd7   :  { %v2388_v34 = vrot.slane %v2384_v31, %v4674_v43 }
 0xdd9   :  { %v2389_v32 = vmul.f32 %v2388_v34, %v2378_v60  ;;  %v2390_v35 = vmul.f32 %v2388_v34, %v2379_v56  ;;  %v2391_v27 = vmul.f32 %v2388_v34, %v2380_v57  ;;  %v2392_v58 = vmul.f32 %v2388_v34, %v2381_v62 }
 0xdda   :  { %v4157_v56 = vpack.c.bf16 %v2462_v55, %v2461_v3 }
 0xddb   :  { %v2399_v63 = vadd.f32 %v2982_v21, %v2389_v32  ;;  %v2400_v26 = vadd.f32 %v2982_v21, %v2390_v35  ;;  %v2401_v1 = vadd.f32 %v2982_v21, %v2391_v27  ;;  %v2402_v5 = vadd.f32 %v2982_v21, %v2392_v58 }
 0xddd   :  { %vm2403_vm7 = vcmp.ge.f32.partialorder %v2399_v63, 0.0  ;;  %vm2404_vm11 = vcmp.ge.f32.partialorder %v2400_v26, 0.0  ;;  %v2407_v12 = vmul.f32 0.01, %v2399_v63  ;;  %v2408_v10 = vmul.f32 0.01, %v2400_v26 }
 0xdde   :  { %vm2405_vm14 = vcmp.ge.f32.partialorder %v2401_v1, 0.0  ;;  %vm2406_vm1 = vcmp.ge.f32.partialorder %v2402_v5, 0.0  ;;  %v2409_v43 = vmul.f32 0.01, %v2401_v1  ;;  %v2410_v13 = vmul.f32 0.01, %v2402_v5 }
 0xddf   :  { %v2411_v17 = vsel %vm2403_vm7, %v2399_v63, %v2407_v12  ;;  %v5220_v25 = vsel %vm2404_vm11, %v2400_v26, %v2408_v10  ;;  %vm2585_vm7 = vcmp.eq.s32.totalorder %v4442_v59, %v2583_v16  ;;  %v4133_v59 = vpack.c.bf16 %v2450_v39, %v2449_v38  ;;  %v2995_v63 = vld [vmem:[%s5355_s20] ss:$0 sm:$0xff] }
 0xde0   :  { %v4081_v29 = vpack.c.bf16 %v5220_v25, %v2411_v17  ;;  %2762 = vmatprep.mubr.f32.mxu0 %v2411_v17  ;;  %v5223_v0 = vsel %vm2405_vm14, %v2401_v1, %v2409_v43  ;;  %v5225_v30 = vsel %vm2406_vm1, %v2402_v5, %v2410_v13  ;;  %vm2590_vm4 = vmand %vm2585_vm7, %vm2586_vm10 }
 0xde1   :  { %v4085_v33 = vpack.c.bf16 %v5225_v30, %v5223_v0  ;;  %v2594_v46 = vsel %vm2590_vm4, 1.0, %v4198_v8  ;;  %v2455_v8 = vld [vmem:[%s5352_s19 + $0x140] sm:$0xff] }
 0xde2   :  { %4082 = vmatprep.subr.bf16.mxu1 %v4081_v29  ;;  %v4145_v51 = vpack.c.bf16 %v2456_v50, %v2455_v8 }
 0xde3   :  { %4084 = vmatpush3.bf16.msra.mxu1 %v4081_v29 }
 0xde4   :  { %4086 = vmatprep.subr.bf16.mxu1 %v4085_v33 }
 0xde7   :  { %4088 = vmatpush3.bf16.msra.mxu1 %v4085_v33 }
 0xde8   :  { %4090 = vmatprep.subr.bf16.mxu1 %v4081_v29 }
 0xdea   :  { %3748 = vmatmul.mubr.msk.f32.vlgmr.msra.gmra.mrb[30].mxu1 %vm2484_vm3, %v2481_v19 }
 0xdeb   :  { %4092 = vmatpush3.bf16.msra.mxu1 %v4081_v29  ;;  %3750 = vmatprep.mubr.msk.f32.mxu1 %vm2484_vm3, %v2482_v36 }
 0xdec   :  { %4094 = vmatprep.subr.bf16.mxu1 %v4085_v33 }
 0xdee   :  { %3751 = vmatmul.mubr.msk.f32.gmra.mrb[32].mxu1 %vm2484_vm3, %v2483_v11 }
 0xdef   :  { %4096 = vmatpush3.bf16.msra.mxu1 %v4085_v33  ;;  %3761 = vmatprep.mubr.msk.f32.mxu1 %vm2484_vm3, %v2591_v15 }
 0xdf0   :  { %4130 = vmatprep.subr.bf16.mxu1 %v4129_v37 }
 0xdf2   :  { %3762 = vmatmul.mubr.msk.f32.vlgmr.msra.gmra.mrb[34].mxu1 %vm2484_vm3, %v2592_v23 }
 0xdf3   :  { %3764 = vmatprep.mubr.msk.f32.mxu1 %vm2484_vm3, %v2593_v40  ;;  %4132 = vmatpush3.bf16.msra.mxu1 %v4129_v37 }
 0xdf4   :  { %4134 = vmatprep.subr.bf16.mxu1 %v4133_v59 }
 0xdf6   :  { %3765 = vmatmul.mubr.msk.f32.gmra.mrb[36].mxu1 %vm2484_vm3, %v2594_v46  ;;  %vm2872_vm3 = vcmask 392192  }
 0xdf7   :  { %4136 = vmatpush3.bf16.msra.mxu1 %v4133_v59 }
 0xdf8   :  { %4138 = vmatprep.subr.bf16.mxu1 %v4137_v4 }
 0xdfb   :  { %4140 = vmatpush3.bf16.msra.mxu1 %v4137_v4 }
 0xdfc   :  { %4142 = vmatprep.subr.bf16.mxu1 %v4141_v49 }
 0xdff   :  { %4144 = vmatpush3.bf16.msra.mxu1 %v4141_v49 }
 0xe00   :  { %4146 = vmatprep.subr.bf16.mxu1 %v4145_v51 }
 0xe03   :  { %4148 = vmatpush3.bf16.msra.mxu1 %v4145_v51 }
 0xe04   :  { %4150 = vmatprep.subr.bf16.mxu1 %v4149_v54 }
 0xe07   :  { %4152 = vmatpush3.bf16.msra.mxu1 %v4149_v54 }
 0xe08   :  { %4154 = vmatprep.subr.bf16.mxu1 %v4153_v61 }
 0xe0b   :  { %4156 = vmatpush3.bf16.msra.mxu1 %v4153_v61 }
 0xe0c   :  { %4158 = vmatprep.subr.bf16.mxu1 %v4157_v56 }
 0xe0f   :  { %4160 = vmatpush3.bf16.msra.mxu1 %v4157_v56 }
 0xebd   :  { %v3749_v57 = vpop.f32.mrb[30].mxu1 }
 0xebe   :  { %v2563_v62 = vpop.f32.mrb[31].mxu1 }
 0xebf   :  { %2763 = vmatmul.mubr.f32.vlgmr.msra.gmra.mrb[16].mxu0 %v2563_v62 }
 0xec0   :  { %2767 = vmatprep.mubr.f32.mxu0 %v5220_v25 }
 0xec1   :  { %v3752_v20 = vpop.f32.mrb[32].mxu1 }
 0xec2   :  { %v2573_v60 = vpop.f32.mrb[33].mxu1 }
 0xec3   :  { %2768 = vmatmul.mubr.f32.gmra.mrb[18].mxu0 %v3749_v57 }
 0xec4   :  { %2772 = vmatprep.mubr.f32.mxu0 %v5223_v0 }
 0xec5   :  { %v3763_v6 = vpop.f32.mrb[34].mxu1 }
 0xec6   :  { %v2673_v24 = vpop.f32.mrb[35].mxu1 }
 0xec7   :  { %2773 = vmatmul.mubr.f32.gmra.mrb[20].mxu0 %v2573_v60  ;;  %3799 = vmatprep.mubr.f32.mxu1 %v2673_v24 }
 0xec8   :  { %2777 = vmatprep.mubr.f32.mxu0 %v5225_v30  ;;  %3800 = vmatmul.mubr.f32.vlgmr.msra.gmra.mrb[38].mxu1 %v3763_v6 }
 0xec9   :  { %v3766_v28 = vpop.f32.mrb[36].mxu1 }
 0xeca   :  { %v2683_v31 = vpop.f32.mrb[37].mxu1 }
 0xecb   :  { %2778 = vmatmul.mubr.f32.gmra.mrb[22].mxu0 %v3752_v20  ;;  %3802 = vmatprep.mubr.f32.mxu1 %v2683_v31 }
 0xecc   :  { %3803 = vmatmul.mubr.f32.gmra.mrb[40].mxu1 %v3766_v28 }
 0xf92   :  { %v3262_v34 = vpop.f32.mrb[16].mxu0 }
 0xf93   :  { %v3263_v21 = vpop.f32.mrb[17].mxu0 }
 0xf94   :  { %v3264_v32 = vadd.f32 %v3263_v21, %v3262_v34 }
 0xf96   :  { %v3265_v35 = vpop.f32.mrb[18].mxu0  ;;  %v2765_v12 = vadd.f32 %v3264_v32, %v2995_v63 }
 0xf97   :  { %v3266_v27 = vpop.f32.mrb[19].mxu0 }
 0xf98   :  { %v3267_v58 = vadd.f32 %v3266_v27, %v3265_v35 }
 0xf9a   :  { %v3268_v26 = vpop.f32.mrb[20].mxu0  ;;  %v2770_v1 = vadd.f32 %v3267_v58, %v2995_v63 }
 0xf9b   :  { %v3269_v5 = vpop.f32.mrb[21].mxu0  ;;  %v3801_v7 = vpop.f32.mrb[38].mxu1 }
 0xf9c   :  { %v3270_v10 = vadd.f32 %v3269_v5, %v3268_v26  ;;  %v2855_v43 = vadd.f32 %v3801_v7, %v2770_v1  ;;  %v2849_v13 = vpop.f32.mrb[39].mxu1 }
 0xf9d   :  { %v2850_v17 = vadd.f32 %v2849_v13, %v2765_v12 }
 0xf9e   :  { %4188 = vtanh.f32 %v2855_v43  ;;  %v3271_v25 = vpop.f32.mrb[22].mxu0  ;;  %v2775_v29 = vadd.f32 %v3270_v10, %v2995_v63 }
 0xf9f   :  { %4190 = vtanh.f32 %v2850_v17  ;;  %v3272_v0 = vpop.f32.mrb[23].mxu0  ;;  %v3804_v30 = vpop.f32.mrb[40].mxu1 }
 0xfa0   :  { %v3273_v9 = vadd.f32 %v3272_v0, %v3271_v25  ;;  %v2859_v33 = vpop.f32.mrb[41].mxu1 }
 0xfa1   :  { %v2860_v18 = vadd.f32 %v2859_v33, %v2775_v29 }
 0xfa2   :  { %v2780_v2 = vadd.f32 %v3273_v9, %v2995_v63 }
 0xfa3   :  { %4192 = vtanh.f32 %v2860_v18 }
 0xfa4   :  { %v2865_v19 = vadd.f32 %v3804_v30, %v2780_v2 }
 0xfa6   :  { %4194 = vtanh.f32 %v2865_v19 }
 0xfa8   :  { %v4189_v36 = vpop.eup %4188 }
 0xfa9   :  { %v4191_v16 = vpop.eup %4190  ;;  %2874 = vst.msk [vmem:[%s5356_s21 + $0x8] sm:$0xff] %vm2872_vm3, %v4189_v36 }
 0xfaa   :  { %2873 = vst.msk [vmem:[%s5356_s21] sm:$0xff] %vm2872_vm3, %v4191_v16 }
 0xfad   :  { %v4193_v14 = vpop.eup %4192 }
 0xfae   :  { %2875 = vst.msk [vmem:[%s5356_s21 + $0x10] sm:$0xff] %vm2872_vm3, %v4193_v14 }
 0xfb0   :  { %v4195_v22 = vpop.eup %4194 }
 0xfb1   :  { %2876 = vst.msk [vmem:[%s5356_s21 + $0x18] sm:$0xff] %vm2872_vm3, %v4195_v22 }

</bundles_post_ra>
